<compile_context>
chip_gen: v6e
topology: v6e:2x2x1
jax: 0.10.0
libtpu: 0.0.40
codegen_flags: <defaults>
</compile_context>

<pallas_src>
import functools

import jax
import jax.numpy as jnp
from jax.experimental import pallas as pl
from jax.experimental.pallas import tpu as pltpu


def _round_up(x, m):
    return (x + m - 1) // m * m


def _choose_pack(sd):
    """Pack factor r: make r*S*D a multiple of 128 f32 lanes, capped at 256."""
    for r in (4, 2):
        if (r * sd) % 128 == 0 and r * sd <= 256:
            return r
    return 1


def _build_weights(p, v, S, D, r, dt):
    """Merged, r-way replicated block-diagonal [p | v] projection.

    W[pos*S*D + s*D + d, s*r + pos]           = p[d]
    W[pos*S*D + s*D + d, S*r + s*r + pos]     = v[d]
    so  (X_packed @ W)[b, s*r + pos]          = logits[b*r + pos, s]
        (X_packed @ W)[b, S*r + s*r + pos]    = X[b*r + pos, s, :] . v
    """
    eye_s = jnp.eye(S, dtype=dt)
    wp = jnp.kron(eye_s, p.astype(dt).reshape(D, 1))        # (S*D, S)
    wv = jnp.kron(eye_s, v.astype(dt).reshape(D, 1))        # (S*D, S)
    eye_r = jnp.eye(r, dtype=dt)
    # 4-D build:  T[pos, row, s, pos2] = blk[row, s] * (pos == pos2)
    wq = (eye_r[:, None, None, :] * wp[None, :, :, None]).reshape(r * S * D, S * r)
    wr = (eye_r[:, None, None, :] * wv[None, :, :, None]).reshape(r * S * D, S * r)
    return jnp.concatenate([wq, wr], axis=1)                 # (r*S*D, 2*S*r)


def _attn_kernel(x_ref, w_ref, o_ref, *, seq_len, pack):
    # x_ref: (bt, pack*S*D)   w_ref: (pack*S*D, 2*S*pack)   o_ref: (bt, pack)
    S, r = seq_len, pack
    x = x_ref[...]
    w = w_ref[...]

    # One MXU pass over the X tile (X is read from HBM exactly once).
    qr = jnp.dot(
        x, w,
        preferred_element_type=jnp.float32,
        precision=jax.lax.Precision.HIGHEST,   # full-f32 contraction on the MXU
    )

    # Column layout: [ q(s, pos) for s, pos | r(s, pos) for s, pos ], pos fast.
    q_s = [qr[:, s * r:(s + 1) * r] for s in range(S)]               # each (bt, r)
    r_s = [qr[:, S * r + s * r: S * r + (s + 1) * r] for s in range(S)]

    # Numerically stable softmax over the sequence axis, fused with the
    # weighted reduction:  out = sum_s softmax(q)_s * r_s.
    m = q_s[0]
    for s in range(1, S):
        m = jnp.maximum(m, q_s[s])
    e_s = [jnp.exp(qs - m) for qs in q_s]
    denom = e_s[0]
    num = e_s[0] * r_s[0]
    for s in range(1, S):
        denom = denom + e_s[s]
        num = num + e_s[s] * r_s[s]
    out = num / denom                                                 # (bt, r)
    o_ref[...] = out.astype(o_ref.dtype)


def single_head_attention(X, p, v, *, tile_bytes=2 * 1024 * 1024):
    """f(X; p, v) = v^T X^T softmax(X p);  X: (B, S, D), p, v: (D,)  ->  (B,)."""
    B, S, D = X.shape
    SD = S * D
    dt = X.dtype
    itemsize = jnp.dtype(dt).itemsize

    r = _choose_pack(SD)
    w = _build_weights(p, v, S, D, r, dt)

    # Pack r batch rows per lane-dense VMEM row (free reshape on contiguous
    # data).  Zero-padded rows give logits=0 -> uniform softmax over Xv=0, so
    # their outputs are exactly 0 and are sliced away below.
    x2 = X.reshape(B, SD)
    Bp = _round_up(B, r)
    if Bp != B:
        x2 = jnp.pad(x2, ((0, Bp - B), (0, 0)))
    Bq = Bp // r
    x2 = x2.reshape(Bq, r * SD)

    # Batch tiling: multiples of 8 sublanes, sized so each grid step moves
    # ~tile_bytes of X (amortizes the ~0.35 us per-step overhead) while the
    # double-buffered tiles stay far below every generation's scoped-VMEM cap.
    row_bytes = r * SD * itemsize
    bt = max(8, min(_round_up(Bq, 8),
                    _round_up(max(1, tile_bytes // row_bytes), 8)))
    Bqp = _round_up(Bq, bt)
    if Bqp != Bq:
        x2 = jnp.pad(x2, ((0, Bqp - Bq), (0, 0)))
    n_tiles = Bqp // bt

    out = pl.pallas_call(
        functools.partial(_attn_kernel, seq_len=S, pack=r),
        out_shape=jax.ShapeDtypeStruct((Bqp, r), dt),
        grid_spec=pltpu.PrefetchScalarGridSpec(
            num_scalar_prefetch=0,
            grid=(n_tiles,),
            in_specs=[
                pl.BlockSpec((bt, r * SD), lambda i: (i, 0)),       # packed X tile
                pl.BlockSpec((r * SD, 2 * S * r), lambda i: (0, 0)),  # merged [p|v] W
            ],
            out_specs=pl.BlockSpec((bt, r), lambda i: (i, 0)),
        ),
        compiler_params=pltpu.CompilerParams(
            dimension_semantics=("parallel",)),
    )(x2, w)

    # De-interleave: packed row b, slot pos  ->  original batch row b*r + pos.
    return out.reshape(Bqp * r)[:B]


def _reference(X, p, v):
    logits = jnp.einsum("bsd,d->bs", X, p,
                        precision=jax.lax.Precision.HIGHEST)
    wgt = jax.nn.softmax(logits, axis=1)
    weighted = jnp.sum(wgt[:, :, None] * X, axis=1)
    return jnp.sum(weighted * v, axis=1)


if __name__ == "__main__":
    # Shapes consistent with the module: X is (batch, 2, d).
    B, S, D = 256, 2, 32
    scale = 0.01  # matches `range = 0.01` in the PyTorch module

    key = jax.random.PRNGKey(0)
    kx, kp, kv = jax.random.split(key, 3)

    X = jax.random.normal(kx, (B, S, D), dtype=jnp.float32)
    p = jax.random.normal(kp, (D,), dtype=jnp.float32) * scale
    v = jax.random.normal(kv, (D,), dtype=jnp.float32) * scale

    fn = jax.jit(single_head_attention)
    out = jax.block_until_ready(fn(X, p, v))

    ref = _reference(X, p, v)
    assert out.shape == (B,)
    assert jnp.allclose(out, ref, atol=2e-6, rtol=1e-5), (out, ref)

    # Also exercise a batch that is not a multiple of the pack factor / tile.
    out2 = jax.block_until_ready(jax.jit(single_head_attention)(X[:37], p, v))
    assert jnp.allclose(out2, ref[:37], atol=2e-6, rtol=1e-5)

    print("KERNEL_OK")
</pallas_src>

<mosaic_0001>
module attributes {stable_mosaic.version = 11 : i64} {
  func.func @_attn_kernel(%arg0: i32, %arg1: memref<64x256xf32, #tpu.memory_space<vmem>>, %arg2: memref<256x16xf32, #tpu.memory_space<vmem>>, %arg3: memref<64x4xf32, #tpu.memory_space<vmem>>) attributes {dimension_semantics = [#tpu.dimension_semantics<parallel>], iteration_bounds = array<i64: 1>, scalar_prefetch = 0 : i64, scratch_operands = 0 : i64, tpu.core_type = #tpu.core_type<tc>, window_params = [{transform_indices = @transform_0, window_bounds = array<i64: 64, 256>}, {pipeline_mode = #tpu.pipeline_mode<synchronous>, transform_indices = @transform_1, window_bounds = array<i64: 256, 16>}, {transform_indices = @transform_2, window_bounds = array<i64: 64, 4>}]} {
    %c0 = arith.constant 0 : index
    %c0_0 = arith.constant 0 : index
    %0 = vector.load %arg1[%c0, %c0_0] : memref<64x256xf32, #tpu.memory_space<vmem>>, vector<64x256xf32>
    %c0_1 = arith.constant 0 : index
    %c0_2 = arith.constant 0 : index
    %1 = vector.load %arg2[%c0_1, %c0_2] : memref<256x16xf32, #tpu.memory_space<vmem>>, vector<256x16xf32>
    %cst = arith.constant dense<0.000000e+00> : vector<64x16xf32>
    %2 = tpu.matmul %0, %1, %cst {dimension_numbers = #tpu.dot_dimension_numbers<[1], [0], [0], [1], [0, 0, 1, 1], [], []>, precision = #tpu.contract_precision<fp32>} : vector<64x256xf32>, vector<256x16xf32>, vector<64x16xf32> -> vector<64x16xf32>
    %3 = vector.extract_strided_slice %2 {offsets = [0, 0], sizes = [64, 4], strides = [1, 1]} : vector<64x16xf32> to vector<64x4xf32>
    %4 = vector.extract_strided_slice %2 {offsets = [0, 4], sizes = [64, 4], strides = [1, 1]} : vector<64x16xf32> to vector<64x4xf32>
    %5 = vector.extract_strided_slice %2 {offsets = [0, 8], sizes = [64, 4], strides = [1, 1]} : vector<64x16xf32> to vector<64x4xf32>
    %6 = vector.extract_strided_slice %2 {offsets = [0, 12], sizes = [64, 4], strides = [1, 1]} : vector<64x16xf32> to vector<64x4xf32>
    %7 = arith.maximumf %3, %4 : vector<64x4xf32>
    %8 = arith.subf %3, %7 : vector<64x4xf32>
    %9 = math.exp %8 : vector<64x4xf32>
    %10 = arith.subf %4, %7 : vector<64x4xf32>
    %11 = math.exp %10 : vector<64x4xf32>
    %12 = arith.mulf %9, %5 : vector<64x4xf32>
    %13 = arith.addf %9, %11 : vector<64x4xf32>
    %14 = arith.mulf %11, %6 : vector<64x4xf32>
    %15 = arith.addf %12, %14 : vector<64x4xf32>
    %16 = arith.divf %15, %13 : vector<64x4xf32>
    %c0_3 = arith.constant 0 : index
    %c0_4 = arith.constant 0 : index
    %17 = vector.load %arg3[%c0_3, %c0_4] : memref<64x4xf32, #tpu.memory_space<vmem>>, vector<64x4xf32>
    tpu.vector_store %arg3[%c0_3, %c0_4], %16 {strides = array<i32>} : memref<64x4xf32, #tpu.memory_space<vmem>>, vector<64x4xf32>,
    return
  }
  func.func @transform_0(%arg0: i32) -> (i32, i32) {
    %c0_i32 = arith.constant 0 : i32
    %c0_i32_0 = arith.constant 0 : i32
    return %arg0, %c0_i32 : i32, i32
  }
  func.func @transform_1(%arg0: i32) -> (i32, i32) {
    %c0_i32 = arith.constant 0 : i32
    %c0_i32_0 = arith.constant 0 : i32
    %c0_i32_1 = arith.constant 0 : i32
    return %c0_i32, %c0_i32_0 : i32, i32
  }
  func.func @transform_2(%arg0: i32) -> (i32, i32) {
    %c0_i32 = arith.constant 0 : i32
    %c0_i32_0 = arith.constant 0 : i32
    return %arg0, %c0_i32 : i32, i32
  }
}

</mosaic_0001>

<bundles_post_ra>
// kernel: single_head_attention.1
= control target key start
LH: loop header
LB: loop body
LE: loop exit
PB: predicated region body
PF: predicated region fallthrough
CT: control target
= control target key end

     0   :  { %s1970_s19 = smov 4   ;;  %s1971_s20 = smov 120   ;;  %vm1569_vm0 = vcmask 31744   ;;  %s3230_s1 = inlined_call_operand.vmem [shape: f32[256,16], index: 1, kind: input, shape index: {}]   ;;  %s3231_s0 = inlined_call_operand.vmem [shape: f32[64,256], index: 0, kind: input, shape index: {}]   ;;  %s3232_s2 = inlined_call_operand.vmem [shape: f32[64,4], index: 2, kind: output, shape index: {}]  }
   0x1   :  { %v58_v0 = vld [vmem:[%s3230_s1 + $0xf8] sm:$0xff]  ;;  %v57_v2 = vld [vmem:[%s3230_s1 + $0xf0] sm:$0xff]  ;;  %v56_v7 = vld [vmem:[%s3230_s1 + $0xe8] sm:$0xff] }
   0x2   :  { %v42_v1 = vld [vmem:[%s3230_s1 + $0x78] sm:$0xff]  ;;  %v1996_v3 = vand.u32 4294901760, %v58_v0  ;;  %v2000_v5 = vand.u32 4294901760, %v57_v2  ;;  %v41_v6 = vld [vmem:[%s3230_s1 + $0x70] sm:$0xff]  ;;  %v40_v8 = vld [vmem:[%s3230_s1 + $0x68] sm:$0xff]  ;;  %v2013_v10 = vand.u32 4294901760, %v56_v7 }
   0x3   :  { %v1998_v4 = vand.u32 4294901760, %v42_v1  ;;  %v2011_v9 = vand.u32 4294901760, %v41_v6  ;;  %v2015_v11 = vand.u32 4294901760, %v40_v8  ;;  %v55_v12 = vld [vmem:[%s3230_s1 + $0xe0] sm:$0xff]  ;;  %v54_v14 = vld [vmem:[%s3230_s1 + $0xd8] sm:$0xff]  ;;  %v2044_v20 = vld [vmem:[%s3230_s1 + $0xd0] sm:$0xff] }
   0x4   :  { %v39_v13 = vld [vmem:[%s3230_s1 + $0x60] sm:$0xff]  ;;  %1582 = vmatprep.subr.mxu0 %v1996_v3  ;;  %v2027_v15 = vand.u32 4294901760, %v55_v12  ;;  %v2031_v17 = vand.u32 4294901760, %v54_v14  ;;  %v2034_v18 = vsub.f32 %v58_v0, %v1996_v3  ;;  %v2039_v19 = vld [vmem:[%s3230_s1 + $0x58] sm:$0xff]  ;;  %v2049_v21 = vld [vmem:[%s3230_s1 + $0x50] sm:$0xff]  ;;  %v2059_v24 = vand.u32 4294901760, %v2044_v20 }
   0x5   :  { %3374 = vst [vmem:[#allocation2_spill] sm:$0xff] %v1998_v4  ;;  %v2029_v16 = vand.u32 4294901760, %v39_v13  ;;  %1583 = vmatpush3.msra.mxu0 %v1998_v4  ;;  %v2053_v22 = vand.u32 4294901760, %v2039_v19  ;;  %v2056_v23 = vsub.f32 %v42_v1, %v1998_v4  ;;  %v2062_v25 = vsub.f32 %v57_v2, %v2000_v5  ;;  %v2067_v26 = vld [vmem:[%s3230_s1 + $0xc8] sm:$0xff]  ;;  %v2077_v28 = vld [vmem:[%s3230_s1 + $0xc0] sm:$0xff]  ;;  %v2129_v46 = vld [vmem:[%s3230_s1 + $0xb8] sm:$0xff] }
   0x6   :  { %3375 = vst [vmem:[#allocation3_spill] sm:$0xff] %v2034_v18  ;;  %v2072_v27 = vld [vmem:[%s3230_s1 + $0x48] sm:$0xff]  ;;  %1584 = vmatprep.subr.mxu0 %v2000_v5  ;;  %v3246_v29 = vand.u32 4294901760, %v2034_v18  ;;  %v2082_v30 = vand.u32 4294901760, %v2049_v21  ;;  %v2085_v31 = vsub.f32 %v41_v6, %v2011_v9  ;;  %v2088_v32 = vand.u32 4294901760, %v2067_v26  ;;  %v2102_v37 = vld [vmem:[%s3230_s1 + $0x40] sm:$0xff] }
   0x7   :  { %3376 = vst [vmem:[#allocation4_spill] sm:$0xff] %v2062_v25  ;;  %1585 = vmatpush3.msra.mxu0 %v2011_v9  ;;  %v3245_v33 = vand.u32 4294901760, %v2056_v23  ;;  %v3243_v34 = vand.u32 4294901760, %v2062_v25  ;;  %v2094_v35 = vsub.f32 %v56_v7, %v2013_v10  ;;  %v2097_v36 = vand.u32 4294901760, %v2072_v27  ;;  %v2142_v51 = vld [vmem:[%s3230_s1 + $0x38] sm:$0xff]  ;;  %v2152_v56 = vld [vmem:[%s3230_s1 + $0xb0] sm:$0xff] }
   0x8   :  { %3377 = vst [vmem:[#allocation5_spill] sm:$0xff] %v2082_v30  ;;  %3378 = vst [vmem:[#allocation6_spill] sm:$0xff] %v2085_v31  ;;  %1586 = vmatprep.subr.mxu0 %v2013_v10  ;;  %v392_v38 = vsub.f32 %v2034_v18, %v3246_v29  ;;  %v3242_v39 = vand.u32 4294901760, %v2085_v31  ;;  %v2110_v40 = vsub.f32 %v40_v8, %v2015_v11  ;;  %v2113_v41 = vand.u32 4294901760, %v2077_v28  ;;  %v2167_v61 = vld [vmem:[%s3230_s1 + $0x30] sm:$0xff]  ;;  %v2182_v2 = vld [vmem:[%s3230_s1 + $0xa8] sm:$0xff] }
   0x9   :  { %3379 = vst [vmem:[#allocation7_spill] sm:$0xff] %v2088_v32  ;;  %3380 = vst [vmem:[#allocation8_spill] sm:$0xff] %v2094_v35  ;;  %1587 = vmatpush3.msra.mxu0 %v2015_v11  ;;  %v280_v42 = vsub.f32 %v2056_v23, %v3245_v33  ;;  %v399_v43 = vsub.f32 %v2062_v25, %v3243_v34  ;;  %v3240_v44 = vand.u32 4294901760, %v2094_v35  ;;  %v2137_v50 = vand.u32 4294901760, %v2102_v37  ;;  %v2318_v33 = vld [vmem:[%s3230_s1 + $0x88] sm:$0xff] }
   0xa   :  { %3381 = vst [vmem:[#allocation9_spill] sm:$0xff] %v2097_v36  ;;  %3382 = vst [vmem:[#allocation10_spill] sm:$0xff] %v2110_v40  ;;  %v2124_v45 = vsub.f32 %v55_v12, %v2027_v15  ;;  %1588 = vmatprep.subr.mxu0 %v2027_v15  ;;  %v393_v47 = vand.u32 4294901760, %v392_v38  ;;  %v287_v48 = vsub.f32 %v2085_v31, %v3242_v39  ;;  %v3238_v49 = vand.u32 4294901760, %v2110_v40 }
   0xb   :  { %3383 = vst [vmem:[#allocation11_spill] sm:$0xff] %v2113_v41  ;;  %3384 = vst [vmem:[#allocation12_spill] sm:$0xff] %v2137_v50  ;;  %1589 = vmatpush3.msra.mxu0 %v2029_v16  ;;  %v281_v52 = vand.u32 4294901760, %v280_v42  ;;  %v400_v53 = vand.u32 4294901760, %v399_v43  ;;  %v406_v54 = vsub.f32 %v2094_v35, %v3240_v44  ;;  %v2159_v59 = vsub.f32 %v39_v13, %v2029_v16  ;;  %v2196_v13 = vld [vmem:[%s3230_s1 + $0x28] sm:$0xff]  ;;  %v2291_v44 = vld [vmem:[%s3230_s1 + $0x90] sm:$0xff] }
   0xc   :  { %v3237_v55 = vand.u32 4294901760, %v2124_v45  ;;  %1590 = vmatprep.subr.mxu0 %v2031_v17  ;;  %1638 = vmatprep.subr.mxu1 %v393_v47  ;;  %v288_v57 = vand.u32 4294901760, %v287_v48  ;;  %v294_v58 = vsub.f32 %v2110_v40, %v3238_v49  ;;  %v2162_v60 = vand.u32 4294901760, %v2129_v46  ;;  %v2275_v49 = vld [vmem:[%s3230_s1 + $0x18] sm:$0xff] }
   0xd   :  { %1591 = vmatpush3.msra.mxu0 %v2053_v22  ;;  %1639 = vmatpush3.msra.mxu1 %v281_v52  ;;  %v407_v62 = vand.u32 4294901760, %v406_v54  ;;  %v2174_v0 = vsub.f32 %v54_v14, %v2031_v17  ;;  %v2177_v1 = vand.u32 4294901760, %v2142_v51  ;;  %v3235_v7 = vand.u32 4294901760, %v2159_v59 }
   0xe   :  { %3385 = vst [vmem:[#allocation13_spill] sm:$0xff] %v2162_v60  ;;  %v413_v63 = vsub.f32 %v2124_v45, %v3237_v55  ;;  %1592 = vmatprep.subr.mxu0 %v2059_v24  ;;  %1640 = vmatprep.subr.mxu1 %v400_v53  ;;  %v295_v6 = vand.u32 4294901760, %v294_v58  ;;  %v2188_v8 = vsub.f32 %v2039_v19, %v2053_v22  ;;  %v2191_v12 = vand.u32 4294901760, %v2152_v56 }
   0xf   :  { %3386 = vst [vmem:[#allocation14_spill] sm:$0xff] %v2177_v1  ;;  %1593 = vmatpush3.msra.mxu0 %v2082_v30  ;;  %1641 = vmatpush3.msra.mxu1 %v288_v57  ;;  %v3233_v38 = vand.u32 4294901760, %v2174_v0  ;;  %v2202_v42 = vsub.f32 %v2044_v20, %v2059_v24  ;;  %v2205_v19 = vand.u32 4294901760, %v2167_v61  ;;  %v301_v43 = vsub.f32 %v2159_v59, %v3235_v7  ;;  %v2222_v20 = vld [vmem:[%s3230_s1 + $0xa0] sm:$0xff] }
  0x10   :  { %3387 = vst [vmem:[#allocation15_spill] sm:$0xff] %v2191_v12  ;;  %v414_v14 = vand.u32 4294901760, %v413_v63  ;;  %1594 = vmatprep.subr.mxu0 %v2088_v32  ;;  %1642 = vmatprep.subr.mxu1 %v407_v62  ;;  %v3234_v47 = vand.u32 4294901760, %v2188_v8  ;;  %v2214_v48 = vsub.f32 %v2049_v21, %v2082_v30  ;;  %v2217_v52 = vand.u32 4294901760, %v2182_v2 }
  0x11   :  { %3388 = vst [vmem:[#allocation16_spill] sm:$0xff] %v2205_v19  ;;  %1595 = vmatpush3.msra.mxu0 %v2097_v36  ;;  %1643 = vmatpush3.msra.mxu1 %v295_v6  ;;  %v420_v53 = vsub.f32 %v2174_v0, %v3233_v38  ;;  %v3236_v54 = vand.u32 4294901760, %v2202_v42  ;;  %v2231_v21 = vsub.f32 %v2067_v26, %v2088_v32  ;;  %v2234_v57 = vand.u32 4294901760, %v2196_v13  ;;  %v2248_v26 = vld [vmem:[%s3230_s1 + $0x20] sm:$0xff] }
  0x12   :  { %3389 = vst [vmem:[#allocation17_spill] sm:$0xff] %v2217_v52  ;;  %1596 = vmatprep.subr.mxu0 %v2113_v41  ;;  %1644 = vmatprep.subr.mxu1 %v414_v14  ;;  %v302_v58 = vand.u32 4294901760, %v301_v43  ;;  %v308_v62 = vsub.f32 %v2188_v8, %v3234_v47  ;;  %v3239_v63 = vand.u32 4294901760, %v2214_v48  ;;  %v2243_v6 = vsub.f32 %v2072_v27, %v2097_v36  ;;  %v2261_v27 = vld [vmem:[%s3230_s1 + $0x98] sm:$0xff] }
  0x13   :  { %3390 = vst [vmem:[#allocation18_spill] sm:$0xff] %v2234_v57  ;;  %1597 = vmatpush3.msra.mxu0 %v2137_v50  ;;  %v421_v38 = vand.u32 4294901760, %v420_v53  ;;  %v427_v14 = vsub.f32 %v2202_v42, %v3236_v54  ;;  %v3241_v43 = vand.u32 4294901760, %v2231_v21  ;;  %v2256_v47 = vand.u32 4294901760, %v2222_v20 }
  0x14   :  { %1645 = vmatpush3.msra.mxu1 %v302_v58  ;;  %1598 = vmatprep.subr.mxu0 %v2162_v60  ;;  %v309_v7 = vand.u32 4294901760, %v308_v62  ;;  %v315_v53 = vsub.f32 %v2214_v48, %v3239_v63  ;;  %v3244_v54 = vand.u32 4294901760, %v2243_v6  ;;  %v2270_v55 = vsub.f32 %v2077_v28, %v2113_v41 }
  0x15   :  { %3391 = vst [vmem:[#allocation19_spill] sm:$0xff] %v2256_v47  ;;  %1646 = vmatprep.subr.mxu1 %v421_v38  ;;  %1599 = vmatpush3.msra.mxu0 %v2177_v1  ;;  %v428_v58 = vand.u32 4294901760, %v427_v14  ;;  %v434_v62 = vsub.f32 %v2231_v21, %v3241_v43  ;;  %v2282_v63 = vand.u32 4294901760, %v2248_v26  ;;  %v2286_v28 = vsub.f32 %v2102_v37, %v2137_v50  ;;  %v2304_v37 = vld [vmem:[%s3230_s1 + $0x10] sm:$0xff] }
  0x16   :  { %1647 = vmatpush3.msra.mxu1 %v309_v7  ;;  %1600 = vmatprep.subr.mxu0 %v2191_v12  ;;  %v316_v38 = vand.u32 4294901760, %v315_v53  ;;  %v322_v14 = vsub.f32 %v2243_v6, %v3244_v54  ;;  %v3249_v43 = vand.u32 4294901760, %v2270_v55  ;;  %v2299_v39 = vand.u32 4294901760, %v2261_v27 }
  0x17   :  { %3392 = vst [vmem:[#allocation20_spill] sm:$0xff] %v2282_v63  ;;  %1648 = vmatprep.subr.mxu1 %v428_v58  ;;  %1601 = vmatpush3.msra.mxu0 %v2205_v19  ;;  %v435_v7 = vand.u32 4294901760, %v434_v62  ;;  %v3250_v53 = vand.u32 4294901760, %v2286_v28  ;;  %v2310_v34 = vsub.f32 %v2129_v46, %v2162_v60  ;;  %v2313_v54 = vand.u32 4294901760, %v2275_v49 }
  0x18   :  { %3393 = vst [vmem:[#allocation21_spill] sm:$0xff] %v2299_v39  ;;  %1649 = vmatpush3.msra.mxu1 %v316_v38  ;;  %1602 = vmatprep.subr.mxu0 %v2217_v52  ;;  %v323_v58 = vand.u32 4294901760, %v322_v14  ;;  %v441_v62 = vsub.f32 %v2270_v55, %v3249_v43  ;;  %v2326_v46 = vsub.f32 %v2142_v51, %v2177_v1  ;;  %v2329_v29 = vand.u32 4294901760, %v2291_v44  ;;  %v2346_v51 = vld [vmem:[%s3230_s1 + $0x8] sm:$0xff] }
  0x19   :  { %3394 = vst [vmem:[#allocation22_spill] sm:$0xff] %v2313_v54  ;;  %1650 = vmatprep.subr.mxu1 %v435_v7  ;;  %1603 = vmatpush3.msra.mxu0 %v2234_v57  ;;  %v329_v38 = vsub.f32 %v2286_v28, %v3250_v53  ;;  %v2338_v60 = vsub.f32 %v2152_v56, %v2191_v12  ;;  %v2341_v43 = vand.u32 4294901760, %v2304_v37  ;;  %v2355_v56 = vand.u32 4294901760, %v2318_v33  ;;  %v2360_v12 = vld [vmem:[%s3230_s1 + $0x80] sm:$0xff] }
  0x1a   :  { %3395 = vst [vmem:[#allocation23_spill] sm:$0xff] %v2329_v29  ;;  %1651 = vmatpush3.msra.mxu1 %v323_v58  ;;  %1604 = vmatprep.subr.mxu0 %v2256_v47  ;;  %v442_v7 = vand.u32 4294901760, %v441_v62  ;;  %v2352_v14 = vsub.f32 %v2167_v61, %v2205_v19  ;;  %v3399_v1 = vand.u32 4294901760, %v2310_v34  ;;  %v2369_v61 = vsub.f32 %v2182_v2, %v2217_v52  ;;  %v2386_v2 = vld [vmem:[%s3230_s1] sm:$0xff] }
  0x1b   :  { %3396 = vst [vmem:[#allocation24_spill] sm:$0xff] %v2341_v43  ;;  %3398 = vst [vmem:[#allocation26_spill] sm:$0xff] %v2355_v56  ;;  %1605 = vmatpush3.msra.mxu0 %v2282_v63  ;;  %v330_v58 = vand.u32 4294901760, %v329_v38  ;;  %v3269_v53 = vand.u32 4294901760, %v2338_v60  ;;  %v3401_v19 = vand.u32 4294901760, %v2326_v46  ;;  %v2377_v38 = vand.u32 4294901760, %v2346_v51 }
  0x1c   :  { %3397 = vst [vmem:[#allocation25_spill] sm:$0xff] %v2352_v14  ;;  %v448_v62 = vsub.f32 %v2310_v34, %v3399_v1  ;;  %3400 = vst [vmem:[#allocation27_spill] sm:$0xff] %v2369_v61  ;;  %1652 = vmatprep.subr.mxu1 %v442_v7  ;;  %1606 = vmatprep.subr.mxu0 %v2299_v39  ;;  %v2381_v1 = vsub.f32 %v2196_v13, %v2234_v57  ;;  %v12_v7 = vld [vmem:[%s3231_s0 + $0x8] sm:$0xff]  ;;  %v2397_v57 = vand.u32 4294901760, %v2360_v12 }
  0x1d   :  { %v336_v50 = vsub.f32 %v2326_v46, %v3401_v19  ;;  %3402 = vst [vmem:[#allocation28_spill] sm:$0xff] %v2377_v38  ;;  %1653 = vmatpush3.msra.mxu1 %v330_v58  ;;  %1607 = vmatpush3.msra.mxu0 %v2313_v54  ;;  %v455_v41 = vsub.f32 %v2338_v60, %v3269_v53  ;;  %v3404_v36 = vand.u32 4294901760, %v2352_v14  ;;  %v11_v53 = vld [vmem:[%s3231_s0] sm:$0xff]  ;;  %v2418_v58 = vand.u32 4294901760, %v12_v7 }
  0x1e   :  { %v449_v19 = vand.u32 4294901760, %v448_v62  ;;  %3403 = vst [vmem:[#allocation29_spill] sm:$0xff] %v2397_v57  ;;  %1608 = vmatprep.subr.mxu0 %v2329_v29  ;;  %v2406_v62 = vsub.f32 %v2222_v20, %v2256_v47  ;;  %v3408_v47 = vand.u32 4294901760, %v2381_v1 }
  0x1f   :  { %v337_v52 = vand.u32 4294901760, %v336_v50  ;;  %v343_v32 = vsub.f32 %v2352_v14, %v3404_v36  ;;  %v456_v13 = vand.u32 4294901760, %v455_v41  ;;  %1609 = vmatpush3.msra.mxu0 %v2341_v43  ;;  %v3405_v50 = vand.u32 4294901760, %v2369_v61  ;;  %3407 = vst [vmem:[#allocation31_spill] sm:$0xff] %v2418_v58  ;;  %501 = vmatprep.mubr.f32.mxu1 %v2418_v58 }
  0x20   :  { %1654 = vmatprep.subr.mxu1 %v449_v19  ;;  %v2416_v36 = vand.u32 4294901760, %v2386_v2  ;;  %1610 = vmatprep.subr.mxu0 %v2355_v56  ;;  %v350_v19 = vsub.f32 %v2381_v1, %v3408_v47  ;;  %v3280_v41 = vand.u32 4294901760, %v2406_v62  ;;  %v2427_v14 = vsub.f32 %v2248_v26, %v2282_v63  ;;  %v14_v47 = vld [vmem:[%s3231_s0 + $0x18] sm:$0xff] }
  0x21   :  { %v462_v30 = vsub.f32 %v2369_v61, %v3405_v50  ;;  %1655 = vmatpush3.msra.mxu1 %v337_v52  ;;  %v344_v20 = vand.u32 4294901760, %v343_v32  ;;  %1611 = vmatpush3.msra.mxu0 %v2377_v38  ;;  %v2431_v61 = vsub.f32 %v12_v7, %v2418_v58  ;;  %v2433_v32 = vand.u32 4294901760, %v11_v53 }
  0x22   :  { %3406 = vst [vmem:[#allocation30_spill] sm:$0xff] %v2416_v36  ;;  %1656 = vmatprep.subr.mxu1 %v456_v13  ;;  %v2437_v52 = vsub.f32 %v2261_v27, %v2299_v39  ;;  %v351_v26 = vand.u32 4294901760, %v350_v19  ;;  %1612 = vmatprep.subr.mxu0 %v2397_v57  ;;  %v3283_v7 = vand.u32 4294901760, %v2427_v14  ;;  %v2449_v13 = vsub.f32 %v2275_v49, %v2313_v54 }
  0x23   :  { %v463_v50 = vand.u32 4294901760, %v462_v30  ;;  %3409 = vst [vmem:[#allocation32_spill] sm:$0xff] %v2431_v61  ;;  %3410 = vst [vmem:[#allocation33_spill] sm:$0xff] %v2433_v32  ;;  %1657 = vmatpush3.msra.mxu1 %v344_v20  ;;  %v469_v30 = vsub.f32 %v2406_v62, %v3280_v41  ;;  %1613 = vmatpush3.msra.mxu0 %v2416_v36  ;;  %v2454_v20 = vsub.f32 %v11_v53, %v2433_v32 }
  0x24   :  { %3411 = vst [vmem:[#allocation34_spill] sm:$0xff] %v2449_v13  ;;  %v2459_v39 = vsub.f32 %v2291_v44, %v2329_v29  ;;  %v357_v49 = vsub.f32 %v2427_v14, %v3283_v7  ;;  %1694 = vmatprep.subr.mxu0 %v2034_v18  ;;  %v2466_v27 = vand.u32 4294901760, %v14_v47  ;;  %v3413_v53 = vand.u32 4294901760, %v2431_v61  ;;  %v13_v7 = vld [vmem:[%s3231_s0 + $0x10] sm:$0xff] }
  0x25   :  { %1658 = vmatprep.subr.mxu1 %v463_v50  ;;  %v470_v41 = vand.u32 4294901760, %v469_v30  ;;  %v3414_v44 = vand.u32 4294901760, %v2437_v52  ;;  %v3415_v29 = vand.u32 4294901760, %v2449_v13  ;;  %v3417_v18 = vand.u32 4294901760, %v2454_v20 }
  0x26   :  { %1659 = vmatpush3.msra.mxu1 %v351_v26  ;;  %3412 = vst [vmem:[#allocation35_spill] sm:$0xff] %v2466_v27  ;;  %v158_v19 = vsub.f32 %v2431_v61, %v3413_v53  ;;  %v358_v50 = vand.u32 4294901760, %v357_v49  ;;  %v2484_v54 = vsub.f32 %v14_v47, %v2466_v27 }
  0x27   :  { %v476_v26 = vsub.f32 %v2437_v52, %v3414_v44  ;;  %1660 = vmatprep.subr.mxu1 %v470_v41  ;;  %v364_v53 = vsub.f32 %v2449_v13, %v3415_v29  ;;  %v2488_v44 = vsub.f32 %v2304_v37, %v2341_v43  ;;  %v164_v63 = vsub.f32 %v2454_v20, %v3417_v18  ;;  %v16_v37 = vld [vmem:[%s3231_s0 + $0x28] sm:$0xff] }
  0x28   :  { %3416 = vst [vmem:[#allocation36_spill] sm:$0xff] %v2484_v54  ;;  %v159_v30 = vand.u32 4294901760, %v158_v19  ;;  %v3418_v41 = vand.u32 4294901760, %v2459_v39  ;;  %1661 = vmatpush3.msra.mxu1 %v358_v50  ;;  %v3296_v29 = vand.u32 4294901760, %v2484_v54  ;;  %v2498_v13 = vand.u32 4294901760, %v13_v7 }
  0x29   :  { %v477_v61 = vand.u32 4294901760, %v476_v26  ;;  %v365_v58 = vand.u32 4294901760, %v364_v53  ;;  %v3295_v47 = vand.u32 4294901760, %v2488_v44  ;;  %v165_v19 = vand.u32 4294901760, %v164_v63 }
  0x2a   :  { %v483_v49 = vsub.f32 %v2459_v39, %v3418_v41  ;;  %3419 = vst [vmem:[#allocation37_spill] sm:$0xff] %v2498_v13  ;;  %160 = vmatprep.mubr.f32.mxu0 %v159_v30  ;;  %v2505_v26 = vsub.f32 %v2318_v33, %v2355_v56  ;;  %v2509_v50 = vsub.f32 %v2346_v51, %v2377_v38  ;;  %v19_v56 = vld [vmem:[%s3231_s0 + $0x40] sm:$0xff] }
  0x2b   :  { %1662 = vmatprep.subr.mxu1 %v477_v61  ;;  %v173_v53 = vsub.f32 %v2484_v54, %v3296_v29  ;;  %v371_v30 = vsub.f32 %v2488_v44, %v3295_v47  ;;  %v2518_v63 = vsub.f32 %v13_v7, %v2498_v13  ;;  %v2522_v33 = vsub.f32 %v2360_v12, %v2397_v57  ;;  %v15_v7 = vld [vmem:[%s3231_s0 + $0x20] sm:$0xff]  ;;  %v18_v12 = vld [vmem:[%s3231_s0 + $0x38] sm:$0xff] }
  0x2c   :  { %v484_v18 = vand.u32 4294901760, %v483_v49  ;;  %3420 = vst [vmem:[#allocation38_spill] sm:$0xff] %v2509_v50  ;;  %1663 = vmatpush3.msra.mxu1 %v365_v58  ;;  %166 = vmatmul.mubr.f32.vlgmr.msra.gmra.mxu0 %v165_v19  ;;  %v3301_v51 = vand.u32 4294901760, %v2505_v26  ;;  %v3304_v61 = vand.u32 4294901760, %v2509_v50  ;;  %v2526_v58 = vand.u32 4294901760, %v16_v37 }
  0x2d   :  { %3421 = vst [vmem:[#allocation39_spill] sm:$0xff] %v2518_v63  ;;  %3422 = vst [vmem:[#allocation40_spill] sm:$0xff] %v2522_v33  ;;  %v2530_v41 = vsub.f32 %v2386_v2, %v2416_v36  ;;  %1695 = vmatpush3.msra.mxu0 %v2056_v23  ;;  %v174_v49 = vand.u32 4294901760, %v173_v53  ;;  %v372_v19 = vand.u32 4294901760, %v371_v30  ;;  %v3306_v47 = vand.u32 4294901760, %v2522_v33 }
  0x2e   :  { %1664 = vmatprep.subr.mxu1 %v484_v18  ;;  %3423 = vst [vmem:[#allocation41_spill] sm:$0xff] %v2526_v58  ;;  %v3305_v18 = vand.u32 4294901760, %v2518_v63  ;;  %1696 = vmatprep.subr.mxu0 %v2062_v25  ;;  %v490_v2 = vsub.f32 %v2505_v26, %v3301_v51  ;;  %v378_v29 = vsub.f32 %v2509_v50, %v3304_v61  ;;  %v2558_v51 = vand.u32 4294901760, %v15_v7 }
  0x2f   :  { %3424 = vst [vmem:[#allocation42_spill] sm:$0xff] %v2530_v41  ;;  %v2549_v36 = vsub.f32 %v16_v37, %v2526_v58  ;;  %v3314_v53 = vand.u32 4294901760, %v2530_v41  ;;  %175 = vmatprep.mubr.f32.mxu0 %v174_v49  ;;  %1665 = vmatpush3.msra.mxu1 %v372_v19  ;;  %v497_v57 = vsub.f32 %v2522_v33, %v3306_v47  ;;  %v2560_v38 = vand.u32 4294901760, %v18_v12  ;;  %v17_v37 = vld [vmem:[%s3231_s0 + $0x30] sm:$0xff]  ;;  %v20_v49 = vld [vmem:[%s3231_s0 + $0x48] sm:$0xff] }
  0x30   :  { %v179_v30 = vsub.f32 %v2518_v63, %v3305_v18  ;;  %3425 = vst [vmem:[#allocation43_spill] sm:$0xff] %v2558_v51  ;;  %1697 = vmatpush3.msra.mxu0 %v2085_v31  ;;  %v491_v19 = vand.u32 4294901760, %v490_v2  ;;  %v379_v61 = vand.u32 4294901760, %v378_v29  ;;  %v22_v63 = vld [vmem:[%s3231_s0 + $0x58] sm:$0xff]  ;;  %v2581_v29 = vsub.f32 %v15_v7, %v2558_v51 }
  0x31   :  { %3426 = vst [vmem:[#allocation44_spill] sm:$0xff] %v2560_v38  ;;  %v3320_v18 = vand.u32 4294901760, %v2549_v36  ;;  %v385_v47 = vsub.f32 %v2530_v41, %v3314_v53  ;;  %1698 = vmatprep.subr.mxu0 %v2094_v35  ;;  %v498_v31 = vand.u32 4294901760, %v497_v57  ;;  %v2584_v2 = vsub.f32 %v18_v12, %v2560_v38  ;;  %v21_v53 = vld [vmem:[%s3231_s0 + $0x50] sm:$0xff] }
  0x32   :  { %v180_v43 = vand.u32 4294901760, %v179_v30  ;;  %3427 = vst [vmem:[#allocation45_spill] sm:$0xff] %v2581_v29  ;;  %1666 = vmatprep.subr.mxu1 %v491_v19  ;;  %1699 = vmatpush3.msra.mxu0 %v2110_v40  ;;  %v2593_v35 = vand.u32 4294901760, %v17_v37  ;;  %v2595_v57 = vand.u32 4294901760, %v20_v49  ;;  %v3321_v7 = vand.u32 4294901760, %v2581_v29 }
  0x33   :  { %3428 = vst [vmem:[#allocation46_spill] sm:$0xff] %v2584_v2  ;;  %v188_v30 = vsub.f32 %v2549_v36, %v3320_v18  ;;  %v386_v54 = vand.u32 4294901760, %v385_v47  ;;  %1667 = vmatpush3.msra.mxu1 %v379_v61  ;;  %v3324_v12 = vand.u32 4294901760, %v2584_v2  ;;  %v2599_v25 = vand.u32 4294901760, %v19_v56  ;;  %1700 = vmatprep.subr.mxu0 %v2124_v45 }
  0x34   :  { %3429 = vst [vmem:[#allocation47_spill] sm:$0xff] %v2593_v35  ;;  %3430 = vst [vmem:[#allocation48_spill] sm:$0xff] %v2595_v57  ;;  %181 = vmatmul.mubr.f32.gmra.mxu0 %v180_v43  ;;  %v2601_v19 = vand.u32 4294901760, %v22_v63  ;;  %1668 = vmatprep.subr.mxu1 %v498_v31  ;;  %v2605_v47 = vsub.f32 %v17_v37, %v2593_v35  ;;  %v2608_v18 = vsub.f32 %v20_v49, %v2595_v57  ;;  %v24_v37 = vld [vmem:[%s3231_s0 + $0x68] sm:$0xff] }
  0x35   :  { %3431 = vst [vmem:[#allocation49_spill] sm:$0xff] %v2599_v25  ;;  %v189_v40 = vand.u32 4294901760, %v188_v30  ;;  %v2610_v43 = vand.u32 4294901760, %v21_v53  ;;  %1669 = vmatpush3.msra.mxu1 %v386_v54  ;;  %1701 = vmatpush3.msra.mxu0 %v2159_v59  ;;  %v194_v61 = vsub.f32 %v2581_v29, %v3321_v7  ;;  %v203_v31 = vsub.f32 %v2584_v2, %v3324_v12 }
  0x36   :  { %3432 = vst [vmem:[#allocation50_spill] sm:$0xff] %v2601_v19  ;;  %3433 = vst [vmem:[#allocation51_spill] sm:$0xff] %v2605_v47  ;;  %v2620_v30 = vsub.f32 %v19_v56, %v2599_v25  ;;  %503 = vmatmul.mubr.f32.vlgmr.msra.gmra.mxu1 %v2433_v32  ;;  %v3329_v54 = vand.u32 4294901760, %v2605_v47  ;;  %v3333_v49 = vand.u32 4294901760, %v2608_v18  ;;  %v2629_v7 = vsub.f32 %v22_v63, %v2601_v19 }
  0x37   :  { %3434 = vst [vmem:[#allocation52_spill] sm:$0xff] %v2610_v43  ;;  %190 = vmatprep.mubr.f32.mxu0 %v189_v40  ;;  %v195_v29 = vand.u32 4294901760, %v194_v61  ;;  %1702 = vmatprep.subr.mxu0 %v2174_v0  ;;  %v204_v56 = vand.u32 4294901760, %v203_v31  ;;  %v23_v40 = vld [vmem:[%s3231_s0 + $0x60] sm:$0xff]  ;;  %v2646_v31 = vsub.f32 %v21_v53, %v2610_v43  ;;  %v2648_v12 = vand.u32 4294901760, %v24_v37  ;;  %v26_v53 = vld [vmem:[%s3231_s0 + $0x78] sm:$0xff] }
  0x38   :  { %1750 = vmatprep.subr.mxu1 %v1996_v3  ;;  %1703 = vmatpush3.msra.mxu0 %v2188_v8  ;;  %v209_v63 = vsub.f32 %v2605_v47, %v3329_v54  ;;  %v218_v61 = vsub.f32 %v2608_v18, %v3333_v49  ;;  %v3436_v2 = vand.u32 4294901760, %v2620_v30  ;;  %v3338_v47 = vand.u32 4294901760, %v2629_v7 }
  0x39   :  { %1751 = vmatpush3.msra.mxu1 %v1998_v4  ;;  %3435 = vst [vmem:[#allocation53_spill] sm:$0xff] %v2648_v12  ;;  %196 = vmatmul.mubr.f32.gmra.mxu0 %v195_v29  ;;  %v2656_v4 = vand.u32 4294901760, %v23_v40 }
  0x3a   :  { %1704 = vmatprep.subr.mxu0 %v2202_v42  ;;  %1752 = vmatprep.subr.mxu1 %v2000_v5  ;;  %v210_v32 = vand.u32 4294901760, %v209_v63  ;;  %v224_v54 = vsub.f32 %v2620_v30, %v3436_v2  ;;  %v219_v29 = vand.u32 4294901760, %v218_v61  ;;  %v2667_v2 = vsub.f32 %v24_v37, %v2648_v12  ;;  %v25_v63 = vld [vmem:[%s3231_s0 + $0x70] sm:$0xff]  ;;  %s1969_s0 = smov 124  }
  0x3b   :  { %205 = vmatprep.mubr.f32.mxu0 %v204_v56  ;;  %3437 = vst [vmem:[#allocation54_spill] sm:$0xff] %v2656_v4  ;;  %508 = vmatprep.mubr.f32.mxu1 %v2466_v27  ;;  %v233_v61 = vsub.f32 %v2629_v7, %v3338_v47  ;;  %v2679_v56 = vsub.f32 %v23_v40, %v2656_v4  ;;  %v2681_v37 = vand.u32 4294901760, %v26_v53  ;;  %v2690_v27 = vand.u32 4294901760, %v25_v63 }
  0x3c   :  { %1705 = vmatpush3.msra.mxu0 %v2214_v48  ;;  %1753 = vmatpush3.msra.mxu1 %v2011_v9  ;;  %3438 = vst [vmem:[#allocation55_spill] sm:$0xff] %v2667_v2  ;;  %v225_v49 = vand.u32 4294901760, %v224_v54 }
  0x3d   :  { %1706 = vmatprep.subr.mxu0 %v2231_v21  ;;  %211 = vmatmul.mubr.f32.gmra.mxu0 %v210_v32  ;;  %3439 = vst [vmem:[#allocation56_spill] sm:$0xff] %v2679_v56  ;;  %3440 = vst [vmem:[#allocation57_spill] sm:$0xff] %v2681_v37  ;;  %v3441_v32 = vand.u32 4294901760, %v2646_v31  ;;  %v234_v40 = vand.u32 4294901760, %v233_v61  ;;  %v3346_v47 = vand.u32 4294901760, %v2679_v56 }
  0x3e   :  { %510 = vmatmul.mubr.f32.gmra.mxu1 %v2498_v13  ;;  %1754 = vmatprep.subr.mxu1 %v2013_v10  ;;  %v3341_v13 = vand.u32 4294901760, %v2667_v2 }
  0x3f   :  { %1707 = vmatpush3.msra.mxu0 %v2243_v6  ;;  %1755 = vmatpush3.msra.mxu1 %v2015_v11  ;;  %v239_v54 = vsub.f32 %v2646_v31, %v3441_v32 }
  0x40   :  { %1708 = vmatprep.subr.mxu0 %v2270_v55  ;;  %1756 = vmatprep.subr.mxu1 %v2027_v15 }
  0x41   :  { %220 = vmatprep.mubr.f32.mxu0 %v219_v29  ;;  %515 = vmatprep.mubr.f32.mxu1 %v2526_v58  ;;  %v2697_v29 = vsub.f32 %v26_v53, %v2681_v37  ;;  %v240_v32 = vand.u32 4294901760, %v239_v54  ;;  %v248_v58 = vsub.f32 %v2667_v2, %v3341_v13  ;;  %v254_v53 = vsub.f32 %v2679_v56, %v3346_v47  ;;  %v3443_v54 = vld [vmem:[#allocation25_spill] sm:$0xff]  ;;  %v3445_v2 = vld [vmem:[#allocation27_spill] sm:$0xff] }
  0x42   :  { %1709 = vmatpush3.msra.mxu0 %v2286_v28  ;;  %1757 = vmatpush3.msra.mxu1 %v2029_v16  ;;  %v3444_v13 = vld [vmem:[#allocation5_spill] sm:$0xff] }
  0x43   :  { %226 = vmatmul.mubr.f32.gmra.mxu0 %v225_v49  ;;  %3442 = vst [vmem:[#allocation58_spill] sm:$0xff] %v2697_v29  ;;  %517 = vmatmul.mubr.f32.gmra.mxu1 %v2558_v51  ;;  %v2707_v49 = vsub.f32 %v25_v63, %v2690_v27  ;;  %v3353_v61 = vand.u32 4294901760, %v2697_v29  ;;  %v249_v63 = vand.u32 4294901760, %v248_v58  ;;  %v255_v47 = vand.u32 4294901760, %v254_v53  ;;  %v3447_v56 = vld [vmem:[#allocation9_spill] sm:$0xff]  ;;  %v3448_v58 = vld [vmem:[#allocation11_spill] sm:$0xff] }
  0x44   :  { %1710 = vmatprep.subr.mxu0 %v2310_v34  ;;  %1758 = vmatprep.subr.mxu1 %v2031_v17  ;;  %v3449_v53 = vld [vmem:[#allocation12_spill] sm:$0xff] }
  0x45   :  { %1711 = vmatpush3.msra.mxu0 %v2326_v46  ;;  %1759 = vmatpush3.msra.mxu1 %v2053_v22  ;;  %v3356_v51 = vand.u32 4294901760, %v2707_v49 }
  0x46   :  { %1712 = vmatprep.subr.mxu0 %v2338_v60  ;;  %1760 = vmatprep.subr.mxu1 %v2059_v24 }
  0x47   :  { %235 = vmatprep.mubr.f32.mxu0 %v234_v40  ;;  %522 = vmatprep.mubr.f32.mxu1 %v2560_v38  ;;  %v3446_v40 = vld [vmem:[#allocation7_spill] sm:$0xff]  ;;  %v263_v38 = vsub.f32 %v2697_v29, %v3353_v61  ;;  %v3450_v61 = vld [vmem:[#allocation13_spill] sm:$0xff]  ;;  %v3451_v29 = vld [vmem:[#allocation34_spill] sm:$0xff] }
  0x48   :  { %1713 = vmatpush3.msra.mxu0 %v3443_v54  ;;  %1761 = vmatpush3.msra.mxu1 %v3444_v13 }
  0x49   :  { %241 = vmatmul.mubr.f32.gmra.mxu0 %v240_v32  ;;  %524 = vmatmul.mubr.f32.gmra.mxu1 %v2593_v35  ;;  %v269_v32 = vsub.f32 %v2707_v49, %v3356_v51  ;;  %v264_v35 = vand.u32 4294901760, %v263_v38  ;;  %v3453_v51 = vld [vmem:[#allocation15_spill] sm:$0xff]  ;;  %v3454_v38 = vld [vmem:[#allocation16_spill] sm:$0xff] }
  0x4a   :  { %1714 = vmatprep.subr.mxu0 %v3445_v2  ;;  %1762 = vmatprep.subr.mxu1 %v3446_v40 }
  0x4b   :  { %1715 = vmatpush3.msra.mxu0 %v2381_v1  ;;  %1763 = vmatpush3.msra.mxu1 %v3447_v56 }
  0x4c   :  { %1716 = vmatprep.subr.mxu0 %v2406_v62  ;;  %1764 = vmatprep.subr.mxu1 %v3448_v58  ;;  %v3452_v58 = vld [vmem:[#allocation14_spill] sm:$0xff] }
  0x4d   :  { %250 = vmatprep.mubr.f32.mxu0 %v249_v63  ;;  %529 = vmatprep.mubr.f32.mxu1 %v2595_v57  ;;  %v270_v63 = vand.u32 4294901760, %v269_v32  ;;  %v3456_v32 = vld [vmem:[#allocation18_spill] sm:$0xff] }
  0x4e   :  { %1717 = vmatpush3.msra.mxu0 %v2427_v14  ;;  %1765 = vmatpush3.msra.mxu1 %v3449_v53 }
  0x4f   :  { %256 = vmatmul.mubr.f32.gmra.mxu0 %v255_v47  ;;  %531 = vmatmul.mubr.f32.gmra.mxu1 %v2599_v25  ;;  %v3455_v47 = vld [vmem:[#allocation17_spill] sm:$0xff]  ;;  %v3461_v25 = vld [vmem:[#allocation3_spill] sm:$0xff] }
  0x50   :  { %1718 = vmatprep.subr.mxu0 %v2437_v52  ;;  %1766 = vmatprep.subr.mxu1 %v3450_v61  ;;  %v3462_v57 = vand.u32 4294901760, %v3461_v25  ;;  %v3472_v25 = vld [vmem:[#allocation39_spill] sm:$0xff] }
  0x51   :  { %1719 = vmatpush3.msra.mxu0 %v3451_v29  ;;  %1767 = vmatpush3.msra.mxu1 %v3452_v58 }
  0x52   :  { %1720 = vmatprep.subr.mxu0 %v2459_v39  ;;  %1768 = vmatprep.subr.mxu1 %v3453_v51 }
  0x53   :  { %265 = vmatprep.mubr.f32.mxu0 %v264_v35  ;;  %536 = vmatprep.mubr.f32.mxu1 %v2601_v19  ;;  %v3457_v35 = vld [vmem:[#allocation19_spill] sm:$0xff]  ;;  %v3458_v19 = vld [vmem:[#allocation32_spill] sm:$0xff] }
  0x54   :  { %1721 = vmatpush3.msra.mxu0 %v2488_v44  ;;  %1769 = vmatpush3.msra.mxu1 %v3454_v38 }
  0x55   :  { %271 = vmatmul.mubr.f32.gmra.mxu0 %v270_v63  ;;  %538 = vmatmul.mubr.f32.gmra.mxu1 %v2610_v43  ;;  %v3459_v63 = vld [vmem:[#allocation20_spill] sm:$0xff]  ;;  %v3460_v43 = vld [vmem:[#allocation21_spill] sm:$0xff] }
  0x56   :  { %1722 = vmatprep.subr.mxu0 %v2505_v26  ;;  %1770 = vmatprep.subr.mxu1 %v3455_v47 }
  0x57   :  { %1723 = vmatpush3.msra.mxu0 %v2509_v50  ;;  %1771 = vmatpush3.msra.mxu1 %v3456_v32 }
  0x58   :  { %1724 = vmatprep.subr.mxu0 %v2522_v33  ;;  %1772 = vmatprep.subr.mxu1 %v3457_v35  ;;  %v3463_v33 = vld [vmem:[#allocation22_spill] sm:$0xff]  ;;  %v3464_v35 = vand.u32 4294901760, %v2056_v23 }
  0x59   :  { %543 = vmatprep.mubr.f32.mxu1 %v2648_v12  ;;  %1725 = vmatpush3.msra.mxu0 %v2530_v41  ;;  %v3465_v12 = vld [vmem:[#allocation23_spill] sm:$0xff]  ;;  %v3466_v41 = vld [vmem:[#allocation4_spill] sm:$0xff]  ;;  %v3473_v23 = vld [vmem:[#allocation26_spill] sm:$0xff] }
  0x5a   :  { %687 = vmatprep.mubr.f32.mxu0 %v3458_v19  ;;  %1773 = vmatpush3.msra.mxu1 %v3459_v63  ;;  %v3467_v32 = vand.u32 4294901760, %v3466_v41  ;;  %v3468_v63 = vld [vmem:[#allocation36_spill] sm:$0xff] }
  0x5b   :  { %690 = vmatmul.mubr.f32.vlgmr.msra.gmra.mxu0 %v2454_v20  ;;  %545 = vmatmul.mubr.f32.gmra.mxu1 %v2656_v4  ;;  %v3469_v4 = vld [vmem:[#allocation24_spill] sm:$0xff] }
  0x5c   :  { %1774 = vmatprep.subr.mxu1 %v3460_v43  ;;  %1806 = vmatprep.subr.mxu0 %v3462_v57  ;;  %v3470_v43 = vld [vmem:[#allocation6_spill] sm:$0xff]  ;;  %v3474_v57 = vld [vmem:[#allocation8_spill] sm:$0xff] }
  0x5d   :  { %1775 = vmatpush3.msra.mxu1 %v3463_v33  ;;  %1807 = vmatpush3.msra.mxu0 %v3464_v35  ;;  %v3471_v50 = vand.u32 4294901760, %v3470_v43  ;;  %v3475_v35 = vand.u32 4294901760, %v3474_v57  ;;  %v3476_v41 = vld [vmem:[#allocation28_spill] sm:$0xff]  ;;  %v3482_v43 = vand.u32 4294901760, %v3458_v19  ;;  %v3483_v57 = vand.u32 4294901760, %v2159_v59  ;;  %v3490_v59 = vld [vmem:[#allocation46_spill] sm:$0xff] }
  0x5e   :  { %1776 = vmatprep.subr.mxu1 %v3465_v12  ;;  %1808 = vmatprep.subr.mxu0 %v3467_v32  ;;  %v3477_v32 = vld [vmem:[#allocation10_spill] sm:$0xff]  ;;  %v3479_v12 = vld [vmem:[#allocation29_spill] sm:$0xff]  ;;  %v3489_v19 = vand.u32 4294901760, %v2202_v42  ;;  %v3495_v42 = vand.u32 4294901760, %v2231_v21  ;;  %v3499_v21 = vand.u32 4294901760, %v2286_v28  ;;  %v3511_v28 = vld [vmem:[#allocation55_spill] sm:$0xff] }
  0x5f   :  { %550 = vmatprep.mubr.f32.mxu1 %v2681_v37  ;;  %696 = vmatprep.mubr.f32.mxu0 %v3468_v63  ;;  %v3478_v37 = vand.u32 4294901760, %v3477_v32  ;;  %v3485_v32 = vld [vmem:[#allocation45_spill] sm:$0xff] }
  0x60   :  { %1777 = vmatpush3.msra.mxu1 %v3469_v4  ;;  %1809 = vmatpush3.msra.mxu0 %v3471_v50  ;;  %v3480_v4 = vand.u32 4294901760, %v2124_v45  ;;  %v3481_v50 = vld [vmem:[#allocation30_spill] sm:$0xff] }
  0x61   :  { %552 = vmatmul.mubr.f32.gmra.mxu1 %v2690_v27  ;;  %699 = vmatmul.mubr.f32.gmra.mxu0 %v3472_v25  ;;  %v3488_v45 = vld [vmem:[#allocation2_spill] sm:$0xff] }
  0x62   :  { %1778 = vmatprep.subr.mxu1 %v3473_v23  ;;  %1810 = vmatprep.subr.mxu0 %v3475_v35  ;;  %v3484_v35 = vand.u32 4294901760, %v2454_v20  ;;  %v3491_v20 = vand.u32 4294901760, %v3468_v63  ;;  %v3537_v63 = vld [vmem:[#allocation21_spill] sm:$0xff] }
  0x63   :  { %1779 = vmatpush3.msra.mxu1 %v3476_v41  ;;  %1811 = vmatpush3.msra.mxu0 %v3478_v37  ;;  %v3486_v37 = vand.u32 4294901760, %v2174_v0  ;;  %v3492_v0 = vand.u32 4294901760, %v2214_v48  ;;  %v3497_v48 = vand.u32 4294901760, %v2270_v55  ;;  %v3503_v55 = vand.u32 4294901760, %v2338_v60 }
  0x64   :  { %1780 = vmatprep.subr.mxu1 %v3479_v12  ;;  %1812 = vmatprep.subr.mxu0 %v3480_v4  ;;  %v3487_v4 = vand.u32 4294901760, %v2188_v8  ;;  %v3494_v8 = vand.u32 4294901760, %v3472_v25  ;;  %v3509_v60 = vand.u32 4294901760, %v2406_v62  ;;  %v3516_v62 = vand.u32 4294901760, %v2437_v52 }
  0x65   :  { %705 = vmatprep.mubr.f32.mxu0 %v2549_v36  ;;  %1781 = vmatpush3.msra.mxu1 %v3481_v50  ;;  %v3521_v52 = vand.u32 4294901760, %v2488_v44 }
  0x66   :  { %857 = vmatprep.mubr.f32.mxu1 %v3482_v43  ;;  %1813 = vmatpush3.msra.mxu0 %v3483_v57  ;;  %v3539_v43 = vld [vmem:[#allocation23_spill] sm:$0xff] }
  0x67   :  { %861 = vmatmul.mubr.f32.vlgmr.msra.gmra.mxu1 %v3484_v35  ;;  %708 = vmatmul.mubr.f32.gmra.mxu0 %v3485_v32  ;;  %v3540_v57 = vld [vmem:[#allocation35_spill] sm:$0xff]  ;;  %v3541_v35 = vld [vmem:[#allocation24_spill] sm:$0xff] }
  0x68   :  { %1814 = vmatprep.subr.mxu0 %v3486_v37  ;;  %1862 = vmatprep.subr.mxu1 %v1996_v3  ;;  %v3493_v3 = vld [vmem:[#allocation51_spill] sm:$0xff]  ;;  %v3543_v37 = vand.u32 4294901760, %v2707_v49 }
  0x69   :  { %1815 = vmatpush3.msra.mxu0 %v3487_v4  ;;  %1863 = vmatpush3.msra.mxu1 %v3488_v45  ;;  %v3544_v4 = vld [vmem:[#allocation41_spill] sm:$0xff]  ;;  %v3546_v45 = vld [vmem:[#allocation44_spill] sm:$0xff] }
  0x6a   :  { %1816 = vmatprep.subr.mxu0 %v3489_v19  ;;  %1864 = vmatprep.subr.mxu1 %v2000_v5  ;;  %v3496_v5 = vand.u32 4294901760, %v2243_v6  ;;  %v3510_v6 = vld [vmem:[#allocation11_spill] sm:$0xff]  ;;  %v3552_v19 = vld [vmem:[#allocation53_spill] sm:$0xff] }
  0x6b   :  { %714 = vmatprep.mubr.f32.mxu0 %v3490_v59  ;;  %868 = vmatprep.mubr.f32.mxu1 %v3491_v20  ;;  %v3554_v20 = vld [vmem:[#allocation57_spill] sm:$0xff] }
  0x6c   :  { %1817 = vmatpush3.msra.mxu0 %v3492_v0  ;;  %1865 = vmatpush3.msra.mxu1 %v2011_v9  ;;  %v3498_v9 = vand.u32 4294901760, %v2549_v36  ;;  %v3513_v36 = vand.u32 4294901760, %v2427_v14  ;;  %v3518_v14 = vand.u32 4294901760, %v2459_v39  ;;  %v3523_v39 = vand.u32 4294901760, %v2505_v26  ;;  %v3533_v26 = vld [vmem:[#allocation31_spill] sm:$0xff] }
  0x6d   :  { %717 = vmatmul.mubr.f32.gmra.mxu0 %v3493_v3  ;;  %872 = vmatmul.mubr.f32.gmra.mxu1 %v3494_v8 }
  0x6e   :  { %1818 = vmatprep.subr.mxu0 %v3495_v42  ;;  %1866 = vmatprep.subr.mxu1 %v2013_v10  ;;  %v3500_v10 = vand.u32 4294901760, %v3485_v32  ;;  %v3542_v32 = vld [vmem:[#allocation37_spill] sm:$0xff] }
  0x6f   :  { %1819 = vmatpush3.msra.mxu0 %v3496_v5  ;;  %1867 = vmatpush3.msra.mxu1 %v2015_v11  ;;  %v3501_v11 = vand.u32 4294901760, %v2310_v34  ;;  %v3505_v34 = vand.u32 4294901760, %v3443_v54  ;;  %v3529_v54 = vld [vmem:[#allocation19_spill] sm:$0xff] }
  0x70   :  { %1820 = vmatprep.subr.mxu0 %v3497_v48  ;;  %1868 = vmatprep.subr.mxu1 %v2027_v15  ;;  %v3502_v15 = vand.u32 4294901760, %v2326_v46  ;;  %v3512_v46 = vand.u32 4294901760, %v2608_v18 }
  0x71   :  { %723 = vmatprep.mubr.f32.mxu0 %v2608_v18  ;;  %879 = vmatprep.mubr.f32.mxu1 %v3498_v9  ;;  %v3519_v18 = vld [vmem:[#allocation58_spill] sm:$0xff] }
  0x72   :  { %1821 = vmatpush3.msra.mxu0 %v3499_v21  ;;  %1869 = vmatpush3.msra.mxu1 %v2029_v16  ;;  %v3504_v16 = vand.u32 4294901760, %v3490_v59  ;;  %v3538_v25 = vand.u32 4294901760, %v3519_v18  ;;  %v3553_v59 = vld [vmem:[#allocation54_spill] sm:$0xff] }
  0x73   :  { %726 = vmatmul.mubr.f32.gmra.mxu0 %v2620_v30  ;;  %883 = vmatmul.mubr.f32.gmra.mxu1 %v3500_v10 }
  0x74   :  { %1822 = vmatprep.subr.mxu0 %v3501_v11  ;;  %1870 = vmatprep.subr.mxu1 %v2031_v17  ;;  %v3506_v17 = vand.u32 4294901760, %v3493_v3 }
  0x75   :  { %1823 = vmatpush3.msra.mxu0 %v3502_v15  ;;  %1871 = vmatpush3.msra.mxu1 %v2053_v22  ;;  %v3507_v22 = vand.u32 4294901760, %v3445_v2  ;;  %v3522_v2 = vand.u32 4294901760, %v2646_v31 }
  0x76   :  { %1824 = vmatprep.subr.mxu0 %v3503_v55  ;;  %1872 = vmatprep.subr.mxu1 %v2059_v24  ;;  %v3508_v24 = vand.u32 4294901760, %v2381_v1  ;;  %v3515_v1 = vand.u32 4294901760, %v2620_v30  ;;  %v3520_v30 = vand.u32 4294901760, %v2629_v7 }
  0x77   :  { %732 = vmatprep.mubr.f32.mxu0 %v2629_v7  ;;  %890 = vmatprep.mubr.f32.mxu1 %v3504_v16  ;;  %v3526_v7 = vld [vmem:[#allocation18_spill] sm:$0xff] }
  0x78   :  { %1825 = vmatpush3.msra.mxu0 %v3505_v34  ;;  %1873 = vmatpush3.msra.mxu1 %v3444_v13  ;;  %v3514_v13 = vld [vmem:[#allocation56_spill] sm:$0xff] }
  0x79   :  { %735 = vmatmul.mubr.f32.gmra.mxu0 %v2646_v31  ;;  %894 = vmatmul.mubr.f32.gmra.mxu1 %v3506_v17  ;;  %v3531_v31 = vld [vmem:[#allocation42_spill] sm:$0xff] }
  0x7a   :  { %1826 = vmatprep.subr.mxu0 %v3507_v22  ;;  %1874 = vmatprep.subr.mxu1 %v3446_v40  ;;  %v3530_v40 = vand.u32 4294901760, %v3511_v28 }
  0x7b   :  { %1827 = vmatpush3.msra.mxu0 %v3508_v24  ;;  %1875 = vmatpush3.msra.mxu1 %v3447_v56  ;;  %v3517_v56 = vand.u32 4294901760, %v3451_v29 }
  0x7c   :  { %1828 = vmatprep.subr.mxu0 %v3509_v60  ;;  %1876 = vmatprep.subr.mxu1 %v3510_v6 }
  0x7d   :  { %741 = vmatprep.mubr.f32.mxu0 %v3511_v28  ;;  %901 = vmatprep.mubr.f32.mxu1 %v3512_v46 }
  0x7e   :  { %1829 = vmatpush3.msra.mxu0 %v3513_v36  ;;  %1877 = vmatpush3.msra.mxu1 %v3449_v53  ;;  %v3534_v53 = vld [vmem:[#allocation20_spill] sm:$0xff] }
  0x7f   :  { %744 = vmatmul.mubr.f32.gmra.mxu0 %v3514_v13  ;;  %905 = vmatmul.mubr.f32.gmra.mxu1 %v3515_v1 }
  0x80   :  { %1830 = vmatprep.subr.mxu0 %v3516_v62  ;;  %1878 = vmatprep.subr.mxu1 %v3450_v61  ;;  %v3527_v61 = vld [vmem:[#allocation40_spill] sm:$0xff] }
  0x81   :  { %1831 = vmatpush3.msra.mxu0 %v3517_v56  ;;  %1879 = vmatpush3.msra.mxu1 %v3452_v58  ;;  %v3528_v44 = vand.u32 4294901760, %v3527_v61  ;;  %v3532_v58 = vand.u32 4294901760, %v3531_v31 }
  0x82   :  { %1832 = vmatprep.subr.mxu0 %v3518_v14  ;;  %1880 = vmatprep.subr.mxu1 %v3453_v51  ;;  %v3524_v51 = vld [vmem:[#allocation38_spill] sm:$0xff] }
  0x83   :  { %750 = vmatprep.mubr.f32.mxu0 %v3519_v18  ;;  %912 = vmatprep.mubr.f32.mxu1 %v3520_v30  ;;  %v3525_v29 = vand.u32 4294901760, %v3524_v51 }
  0x84   :  { %1833 = vmatpush3.msra.mxu0 %v3521_v52  ;;  %1881 = vmatpush3.msra.mxu1 %v3454_v38  ;;  %v3535_v38 = vld [vmem:[#allocation33_spill] sm:$0xff] }
  0x85   :  { %753 = vmatmul.mubr.f32.gmra.mxu0 %v2707_v49  ;;  %916 = vmatmul.mubr.f32.gmra.mxu1 %v3522_v2  ;;  %v3547_v49 = vld [vmem:[#allocation47_spill] sm:$0xff] }
  0x86   :  { %1834 = vmatprep.subr.mxu0 %v3523_v39  ;;  %1882 = vmatprep.subr.mxu1 %v3455_v47  ;;  %v3536_v47 = vand.u32 4294901760, %v3514_v13 }
  0x87   :  { %1835 = vmatpush3.msra.mxu0 %v3525_v29  ;;  %1883 = vmatpush3.msra.mxu1 %v3526_v7 }
  0x88   :  { %1836 = vmatprep.subr.mxu0 %v3528_v44  ;;  %1884 = vmatprep.subr.mxu1 %v3529_v54 }
  0x89   :  { %923 = vmatprep.mubr.f32.mxu1 %v3530_v40  ;;  %1837 = vmatpush3.msra.mxu0 %v3532_v58 }
  0x8a   :  { %1104 = vmatprep.mubr.f32.mxu0 %v3533_v26  ;;  %1885 = vmatpush3.msra.mxu1 %v3534_v53 }
  0x8b   :  { %1106 = vmatmul.mubr.f32.vlgmr.msra.gmra.mxu0 %v3535_v38  ;;  %927 = vmatmul.mubr.f32.gmra.mxu1 %v3536_v47 }
  0x8c   :  { %1886 = vmatprep.subr.mxu1 %v3537_v63  ;;  %934 = vmatprep.mubr.f32.mxu1 %v3538_v25 }
  0x8d   :  { %1887 = vmatpush3.msra.mxu1 %v3463_v33  ;;  %1111 = vmatprep.mubr.f32.mxu0 %v3540_v57  ;;  %v3545_v33 = vld [vmem:[#allocation43_spill] sm:$0xff] }
  0x8e   :  { %1888 = vmatprep.subr.mxu1 %v3539_v43 }
  0x8f   :  { %1889 = vmatpush3.msra.mxu1 %v3541_v35  ;;  %1113 = vmatmul.mubr.f32.gmra.mxu0 %v3542_v32 }
  0x90   :  { %938 = vmatmul.mubr.f32.gmra.mxu1 %v3543_v37  ;;  %1890 = vmatprep.subr.mxu1 %v3473_v23  ;;  %v3548_v23 = vld [vmem:[#allocation48_spill] sm:$0xff] }
  0x91   :  { %1891 = vmatpush3.msra.mxu1 %v3476_v41  ;;  %1118 = vmatprep.mubr.f32.mxu0 %v3544_v4  ;;  %v3550_v41 = vld [vmem:[#allocation50_spill] sm:$0xff] }
  0x92   :  { %1892 = vmatprep.subr.mxu1 %v3479_v12  ;;  %1257 = vmatprep.mubr.f32.mxu1 %v3533_v26  ;;  %v3549_v12 = vld [vmem:[#allocation49_spill] sm:$0xff] }
  0x93   :  { %1893 = vmatpush3.msra.mxu1 %v3481_v50  ;;  %1120 = vmatmul.mubr.f32.gmra.mxu0 %v3545_v33  ;;  %v3551_v50 = vld [vmem:[#allocation52_spill] sm:$0xff] }
  0x94   :  { %1259 = vmatmul.mubr.f32.vlgmr.msra.gmra.mxu1 %v3535_v38  ;;  %1125 = vmatprep.mubr.f32.mxu0 %v3546_v45 }
  0x95   :  { %1264 = vmatprep.mubr.f32.mxu1 %v3540_v57 }
  0x97   :  { %1127 = vmatmul.mubr.f32.gmra.mxu0 %v3547_v49 }
  0x98   :  { %1266 = vmatmul.mubr.f32.gmra.mxu1 %v3542_v32  ;;  %1132 = vmatprep.mubr.f32.mxu0 %v3548_v23 }
  0x99   :  { %1271 = vmatprep.mubr.f32.mxu1 %v3544_v4 }
  0x9b   :  { %1134 = vmatmul.mubr.f32.gmra.mxu0 %v3549_v12 }
  0x9c   :  { %1273 = vmatmul.mubr.f32.gmra.mxu1 %v3545_v33  ;;  %1139 = vmatprep.mubr.f32.mxu0 %v3550_v41 }
  0x9d   :  { %1278 = vmatprep.mubr.f32.mxu1 %v3546_v45 }
  0x9f   :  { %1141 = vmatmul.mubr.f32.gmra.mxu0 %v3551_v50 }
  0xa0   :  { %1280 = vmatmul.mubr.f32.gmra.mxu1 %v3547_v49  ;;  %1146 = vmatprep.mubr.f32.mxu0 %v3552_v19 }
  0xa1   :  { %1285 = vmatprep.mubr.f32.mxu1 %v3548_v23 }
  0xa3   :  { %1148 = vmatmul.mubr.f32.gmra.mxu0 %v3553_v59 }
  0xa4   :  { %1287 = vmatmul.mubr.f32.gmra.mxu1 %v3549_v12  ;;  %1153 = vmatprep.mubr.f32.mxu0 %v3554_v20 }
  0xa5   :  { %1292 = vmatprep.mubr.f32.mxu1 %v3550_v41 }
  0xa7   :  { %1155 = vmatmul.mubr.f32.gmra.mxu0 %v2690_v27 }
  0xa8   :  { %1294 = vmatmul.mubr.f32.gmra.mxu1 %v3551_v50 }
  0xa9   :  { %1299 = vmatprep.mubr.f32.mxu1 %v3552_v19 }
  0xac   :  { %1301 = vmatmul.mubr.f32.gmra.mxu1 %v3553_v59 }
  0xad   :  { %1306 = vmatprep.mubr.f32.mxu1 %v3554_v20 }
  0xb0   :  { %1308 = vmatmul.mubr.f32.gmra.mxu1 %v2690_v27 }
  0xec   :  { %v2943_v0 = vpop.f32.mrf.mxu0 }
  0xee   :  { %v2945_v3 = vpop.f32.mrf.mxu0 }
  0xf4   :  { %v2947_v8 = vpop.f32.mrf.mxu0 }
  0xf6   :  { %v2949_v42 = vpop.f32.mrf.mxu0  ;;  %v1670_v5 = vpop.f32.mrf.mxu1 }
  0xf8   :  { %v1671_v9 = vpop.f32.mrf.mxu1 }
  0xf9   :  { %v2951_v48 = vpop.f32.mrf.mxu0  ;;  %v1672_v59 = vadd.f32 %v1671_v9, %v1670_v5 }
  0xfb   :  { %v2953_v21 = vpop.f32.mrf.mxu0 }
  0xfd   :  { %v2955_v10 = vpop.f32.mrf.mxu0 }
  0xfe   :  { %v1673_v11 = vpop.f32.mrf.mxu1 }
  0xff   :  { %v2957_v15 = vpop.f32.mrf.mxu0 }
 0x100   :  { %v1674_v27 = vpop.f32.mrf.mxu1 }
 0x103   :  { %v2959_v55 = vpop.f32.mrf.mxu0  ;;  %v2961_v16 = vpop.f32.mrf.mxu1 }
 0x105   :  { %v2963_v34 = vpop.f32.mrf.mxu0  ;;  %v2965_v17 = vpop.f32.mrf.mxu1 }
 0x109   :  { %v2967_v22 = vpop.f32.mrf.mxu0  ;;  %v2969_v24 = vpop.f32.mrf.mxu1 }
 0x10b   :  { %v2971_v60 = vpop.f32.mrf.mxu0  ;;  %v2973_v6 = vpop.f32.mrf.mxu1 }
 0x10f   :  { %v2975_v28 = vpop.f32.mrf.mxu0  ;;  %v2977_v46 = vpop.f32.mrf.mxu1 }
 0x110   :  { %3555 = vst [vmem:[#allocation25_spill] sm:$0xff] %v2975_v28 }
 0x111   :  { %v2979_v36 = vpop.f32.mrf.mxu0  ;;  %v2981_v13 = vpop.f32.mrf.mxu1 }
 0x112   :  { %3556 = vst [vmem:[#allocation5_spill] sm:$0xff] %v2979_v36 }
 0x115   :  { %v2983_v1 = vpop.f32.mrf.mxu0  ;;  %v2985_v62 = vpop.f32.mrf.mxu1 }
 0x116   :  { %3557 = vst [vmem:[#allocation27_spill] sm:$0xff] %v2983_v1  ;;  %v1616_v1 = vadd.f32 %v2945_v3, %v2943_v0  ;;  %v1678_v0 = vadd.f32 %v2965_v17, %v2961_v16  ;;  %v1681_v16 = vadd.f32 %v2973_v6, %v2969_v24  ;;  %v1684_v6 = vadd.f32 %v2981_v13, %v2977_v46 }
 0x117   :  { %v2987_v56 = vpop.f32.mrf.mxu0  ;;  %v2989_v14 = vpop.f32.mrf.mxu1 }
 0x118   :  { %3558 = vst [vmem:[#allocation7_spill] sm:$0xff] %v2987_v56 }
 0x11b   :  { %v1726_v18 = vpop.f32.mrf.mxu0  ;;  %v2991_v30 = vpop.f32.mrf.mxu1 }
 0x11d   :  { %v2993_v52 = vpop.f32.mrf.mxu1  ;;  %v1727_v2 = vpop.f32.mrf.mxu0 }
 0x121   :  { %v2995_v39 = vpop.f32.mrf.mxu1  ;;  %v1729_v51 = vpop.f32.mrf.mxu0 }
 0x122   :  { %3559 = vst [vmem:[#allocation9_spill] sm:$0xff] %v2995_v39 }
 0x123   :  { %v2997_v29 = vpop.f32.mrf.mxu1  ;;  %v1730_v7 = vpop.f32.mrf.mxu0 }
 0x124   :  { %3560 = vst [vmem:[#allocation12_spill] sm:$0xff] %v2997_v29  ;;  %v1728_v29 = vadd.f32 %v1727_v2, %v1726_v18  ;;  %v1731_v9 = vadd.f32 %v1730_v7, %v1729_v51 }
 0x127   :  { %v1782_v61 = vpop.f32.mrf.mxu1  ;;  %v1732_v44 = vpop.f32.mrf.mxu0 }
 0x129   :  { %v1733_v54 = vpop.f32.mrf.mxu0  ;;  %v1783_v40 = vpop.f32.mrf.mxu1 }
 0x12a   :  { %v1784_v36 = vadd.f32 %v1783_v40, %v1782_v61 }
 0x12d   :  { %v2999_v31 = vpop.f32.mrf.mxu0  ;;  %v1785_v58 = vpop.f32.mrf.mxu1 }
 0x12f   :  { %v1736_v26 = vpop.f32.mrf.mxu0  ;;  %v1786_v53 = vpop.f32.mrf.mxu1 }
 0x133   :  { %v3001_v38 = vpop.f32.mrf.mxu0  ;;  %v1788_v47 = vpop.f32.mrf.mxu1 }
 0x135   :  { %v3003_v63 = vpop.f32.mrf.mxu0  ;;  %v1789_v25 = vpop.f32.mrf.mxu1 }
 0x139   :  { %v3005_v43 = vpop.f32.mrf.mxu0  ;;  %v3007_v57 = vpop.f32.mrf.mxu1 }
 0x13b   :  { %v3009_v35 = vpop.f32.mrf.mxu0  ;;  %v3011_v32 = vpop.f32.mrf.mxu1 }
 0x13f   :  { %v3013_v37 = vpop.f32.mrf.mxu0  ;;  %v3015_v4 = vpop.f32.mrf.mxu1 }
 0x140   :  { %3561 = vst [vmem:[#allocation13_spill] sm:$0xff] %v3013_v37  ;;  %v1675_v37 = vadd.f32 %v1674_v27, %v1673_v11  ;;  %v1622_v11 = vadd.f32 %v2953_v21, %v2951_v48  ;;  %v1734_v27 = vadd.f32 %v1733_v54, %v1732_v44  ;;  %v1625_v48 = vadd.f32 %v2957_v15, %v2955_v10 }
 0x141   :  { %v3017_v33 = vpop.f32.mrf.mxu0  ;;  %v3019_v45 = vpop.f32.mrf.mxu1  ;;  %v1737_v54 = vadd.f32 %v1736_v26, %v2999_v31  ;;  %v1793_v10 = vadd.f32 %v3011_v32, %v3007_v57  ;;  %v1740_v26 = vadd.f32 %v3003_v63, %v3001_v38  ;;  %v1687_v32 = vadd.f32 %v2989_v14, %v2985_v62 }
 0x142   :  { %3562 = vst [vmem:[#allocation34_spill] sm:$0xff] %v3017_v33  ;;  %v1631_v63 = vadd.f32 %v2971_v60, %v2967_v22  ;;  %v1690_v14 = vadd.f32 %v2993_v52, %v2991_v30 }
 0x145   :  { %v3021_v49 = vpop.f32.mrf.mxu0  ;;  %v3023_v23 = vpop.f32.mrf.mxu1 }
 0x146   :  { %3563 = vst [vmem:[#allocation14_spill] sm:$0xff] %v3021_v49  ;;  %v505_v49 = vadd.f32 %v1672_v59, %v1616_v1 }
 0x147   :  { %v3025_v12 = vpop.f32.mrf.mxu0  ;;  %v3027_v41 = vpop.f32.mrf.mxu1 }
 0x148   :  { %3564 = vst [vmem:[#allocation15_spill] sm:$0xff] %v3025_v12  ;;  %3565 = vst [vmem:[#allocation16_spill] sm:$0xff] %v3027_v41  ;;  %v692_v5 = vadd.f32 %v1728_v29, %v505_v49  ;;  %v519_v29 = vadd.f32 %v1678_v0, %v1622_v11 }
 0x14a   :  { %v863_v2 = vadd.f32 %v1784_v36, %v692_v5  ;;  %v710_v21 = vadd.f32 %v1734_v27, %v519_v29 }
 0x14b   :  { %v1838_v50 = vpop.f32.mrf.mxu0  ;;  %v3029_v19 = vpop.f32.mrf.mxu1 }
 0x14c   :  { %3566 = vst [vmem:[#allocation17_spill] sm:$0xff] %v3029_v19  ;;  %v1619_v19 = vadd.f32 %v2949_v42, %v2947_v8 }
 0x14d   :  { %v1839_v20 = vpop.f32.mrf.mxu0  ;;  %v3031_v56 = vpop.f32.mrf.mxu1 }
 0x14e   :  { %3567 = vst [vmem:[#allocation32_spill] sm:$0xff] %v3031_v56  ;;  %v1840_v41 = vadd.f32 %v1839_v20, %v1838_v50  ;;  %v512_v18 = vadd.f32 %v1675_v37, %v1619_v19  ;;  %v1790_v37 = vadd.f32 %v1789_v25, %v1788_v47  ;;  %v526_v25 = vadd.f32 %v1681_v16, %v1625_v48 }
 0x14f   :  { %v1841_v39 = vpop.f32.mrf.mxu0  ;;  %v3569_v22 = vld [vmem:[#allocation16_spill] sm:$0xff] }
 0x150   :  { %v3035_v33 = vpop.f32.mrf.mxu1  ;;  %v701_v40 = vadd.f32 %v1731_v9, %v512_v18  ;;  %v1108_v59 = vadd.f32 %v1840_v41, %v863_v2  ;;  %v719_v41 = vadd.f32 %v1737_v54, %v526_v25  ;;  %v1799_v60 = vadd.f32 %v3569_v22, %v3023_v23 }
 0x151   :  { %3568 = vst [vmem:[#allocation3_spill] sm:$0xff] %v3035_v33  ;;  %v1842_v12 = vpop.f32.mrf.mxu0  ;;  %v1787_v33 = vadd.f32 %v1786_v53, %v1785_v58 }
 0x152   :  { %v3037_v28 = vpop.f32.mrf.mxu1  ;;  %v1843_v8 = vadd.f32 %v1842_v12, %v1841_v39  ;;  %v896_v5 = vadd.f32 %v1793_v10, %v719_v41  ;;  %v3581_v10 = vld [vmem:[#allocation15_spill] sm:$0xff] }
 0x153   :  { %v1844_v56 = vpop.f32.mrf.mxu0  ;;  %v874_v17 = vadd.f32 %v1787_v33, %v701_v40  ;;  %v885_v33 = vadd.f32 %v1790_v37, %v710_v21  ;;  %v3574_v37 = vld [vmem:[#allocation9_spill] sm:$0xff] }
 0x154   :  { %v1894_v3 = vpop.f32.mrf.mxu1 }
 0x155   :  { %v1845_v1 = vpop.f32.mrf.mxu0  ;;  %v1115_v39 = vadd.f32 %v1843_v8, %v874_v17  ;;  %v3573_v8 = vld [vmem:[#allocation34_spill] sm:$0xff]  ;;  %v3577_v54 = vld [vmem:[#allocation32_spill] sm:$0xff] }
 0x156   :  { %v1895_v61 = vpop.f32.mrf.mxu1  ;;  %v1846_v53 = vadd.f32 %v1845_v1, %v1844_v56  ;;  %v1628_v56 = vadd.f32 %v2963_v34, %v2959_v55  ;;  %v1796_v55 = vadd.f32 %v3019_v45, %v3015_v4  ;;  %v540_v45 = vadd.f32 %v1687_v32, %v1631_v63 }
 0x157   :  { %v1896_v42 = vadd.f32 %v1895_v61, %v1894_v3  ;;  %v1847_v51 = vpop.f32.mrf.mxu0  ;;  %v1743_v3 = vadd.f32 %v3009_v35, %v3005_v43  ;;  %v3570_v43 = vld [vmem:[#allocation25_spill] sm:$0xff] }
 0x158   :  { %v1897_v7 = vpop.f32.mrf.mxu1  ;;  %v1122_v50 = vadd.f32 %v1846_v53, %v885_v33  ;;  %v533_v20 = vadd.f32 %v1684_v6, %v1628_v56  ;;  %v3571_v35 = vld [vmem:[#allocation5_spill] sm:$0xff]  ;;  %v3580_v33 = vld [vmem:[#allocation14_spill] sm:$0xff] }
 0x159   :  { %v3047_v36 = vadd.f32 %v1896_v42, %v1108_v59  ;;  %v1848_v58 = vpop.f32.mrf.mxu0  ;;  %v1634_v40 = vadd.f32 %v3571_v35, %v3570_v43  ;;  %v3572_v59 = vld [vmem:[#allocation13_spill] sm:$0xff]  ;;  %v737_v29 = vadd.f32 %v1743_v3, %v540_v45 }
 0x15a   :  { %v1898_v44 = vpop.f32.mrf.mxu1  ;;  %v1849_v19 = vadd.f32 %v1848_v58, %v1847_v51  ;;  %v728_v9 = vadd.f32 %v1740_v26, %v533_v20  ;;  %v1746_v42 = vadd.f32 %v3573_v8, %v3572_v59  ;;  %v3575_v58 = vld [vmem:[#allocation12_spill] sm:$0xff] }
 0x15b   :  { %v1899_v49 = vadd.f32 %v1898_v44, %v1897_v7  ;;  %1321 = vrot.lane.b32.xlu0 %v3047_v36, %s1969_s0  ;;  %v1850_v24 = vpop.f32.mrf.mxu0  ;;  %v547_v52 = vadd.f32 %v1690_v14, %v1634_v40  ;;  %v1693_v48 = vadd.f32 %v3575_v58, %v3574_v37  ;;  %v918_v21 = vadd.f32 %v1799_v60, %v737_v29  ;;  %v3576_v44 = vld [vmem:[#allocation17_spill] sm:$0xff] }
 0x15c   :  { %v1900_v47 = vpop.f32.mrf.mxu1  ;;  %v1129_v18 = vadd.f32 %v1849_v19, %v896_v5  ;;  %v907_v11 = vadd.f32 %v1796_v55, %v728_v9 }
 0x15d   :  { %v3058_v15 = vadd.f32 %v1899_v49, %v1115_v39  ;;  %v1851_v31 = vpop.f32.mrf.mxu0  ;;  %v1802_v39 = vadd.f32 %v3577_v54, %v3576_v44  ;;  %v3578_v49 = vld [vmem:[#allocation27_spill] sm:$0xff] }
 0x15e   :  { %v1901_v12 = vpop.f32.mrf.mxu1  ;;  %v1852_v2 = vadd.f32 %v1851_v31, %v1850_v24  ;;  %v3579_v24 = vld [vmem:[#allocation7_spill] sm:$0xff]  ;;  %v1749_v31 = vadd.f32 %v3581_v10, %v3580_v33 }
 0x15f   :  { %v1902_v46 = vadd.f32 %v1901_v12, %v1900_v47  ;;  %1323 = vrot.lane.b32.xlu0 %v3058_v15, %s1969_s0  ;;  %v1853_v13 = vpop.f32.mrf.mxu0  ;;  %v1637_v6 = vadd.f32 %v3579_v24, %v3578_v49  ;;  %v746_v47 = vadd.f32 %v1746_v42, %v547_v52 }
 0x160   :  { %v1903_v57 = vpop.f32.mrf.mxu1  ;;  %v1136_v7 = vadd.f32 %v1852_v2, %v907_v11 }
 0x161   :  { %v3070_v34 = vadd.f32 %v1902_v46, %v1122_v50  ;;  %v1854_v38 = vpop.f32.mrf.mxu0  ;;  %v554_v19 = vadd.f32 %v1693_v48, %v1637_v6  ;;  %v929_v46 = vadd.f32 %v1802_v39, %v746_v47 }
 0x162   :  { %v1904_v0 = vpop.f32.mrf.mxu1  ;;  %v1855_v16 = vadd.f32 %v1854_v38, %v1853_v13  ;;  %v3582_v13 = vld [vmem:[#allocation3_spill] sm:$0xff] }
 0x163   :  { %v1905_v1 = vadd.f32 %v1904_v0, %v1903_v57  ;;  %1325 = vrot.lane.b32.xlu1 %v3070_v34, %s1969_s0  ;;  %v1856_v62 = vpop.f32.mrf.mxu0  ;;  %v1805_v20 = vadd.f32 %v3037_v28, %v3582_v13  ;;  %v755_v5 = vadd.f32 %v1749_v31, %v554_v19 }
 0x164   :  { %v1906_v4 = vpop.f32.mrf.mxu1  ;;  %v1143_v56 = vadd.f32 %v1855_v16, %v918_v21 }
 0x165   :  { %v3082_v27 = vadd.f32 %v1905_v1, %v1129_v18  ;;  %v1857_v61 = vpop.f32.mrf.mxu0  ;;  %v940_v0 = vadd.f32 %v1805_v20, %v755_v5 }
 0x166   :  { %v1907_v51 = vpop.f32.mrf.mxu1  ;;  %v1858_v26 = vadd.f32 %v1857_v61, %v1856_v62 }
 0x167   :  { %v1908_v30 = vadd.f32 %v1907_v51, %v1906_v4  ;;  %1327 = vrot.lane.b32.xlu1 %v3082_v27, %s1969_s0  ;;  %v1859_v17 = vpop.f32.mrf.mxu0 }
 0x168   :  { %v1909_v23 = vpop.f32.mrf.mxu1  ;;  %v1150_v55 = vadd.f32 %v1858_v26, %v929_v46 }
 0x169   :  { %v3094_v53 = vadd.f32 %v1908_v30, %v1136_v7  ;;  %v1860_v41 = vpop.f32.mrf.mxu0 }
 0x16a   :  { %v1910_v25 = vpop.f32.mrf.mxu1  ;;  %v1861_v38 = vadd.f32 %v1860_v41, %v1859_v17 }
 0x16b   :  { %v1911_v12 = vadd.f32 %v1910_v25, %v1909_v23  ;;  %1329 = vrot.lane.b32.xlu0 %v3094_v53, %s1969_s0 }
 0x16c   :  { %v1912_v50 = vpop.f32.mrf.mxu1  ;;  %v1157_v2 = vadd.f32 %v1861_v38, %v940_v0 }
 0x16d   :  { %v3104_v57 = vadd.f32 %v1911_v12, %v1143_v56 }
 0x16e   :  { %v1913_v32 = vpop.f32.mrf.mxu1 }
 0x16f   :  { %v1914_v63 = vadd.f32 %v1913_v32, %v1912_v50  ;;  %1331 = vrot.lane.b32.xlu1 %v3104_v57, %s1969_s0 }
 0x170   :  { %v1915_v9 = vpop.f32.mrf.mxu1 }
 0x171   :  { %v3108_v3 = vadd.f32 %v1914_v63, %v1150_v55 }
 0x172   :  { %v1916_v18 = vpop.f32.mrf.mxu1 }
 0x173   :  { %v1917_v1 = vadd.f32 %v1916_v18, %v1915_v9  ;;  %1333 = vrot.lane.b32.xlu0 %v3108_v3, %s1969_s0 }
 0x175   :  { %v3112_v28 = vadd.f32 %v1917_v1, %v1157_v2 }
 0x177   :  { %1335 = vrot.lane.b32.xlu1 %v3112_v28, %s1969_s0 }
 0x1cd   :  { %v1322_v62 = vpop.permute.xlu0 %1321 }
 0x1ce   :  { %v1345_v14 = vmax.f32 %v3047_v36, %v1322_v62 }
 0x1d0   :  { %1385 = vrot.lane.b32.xlu0 %v1345_v14, %s1970_s19  ;;  %v1353_v23 = vsub.f32 %v3047_v36, %v1345_v14 }
 0x1d1   :  { %v1324_v4 = vpop.permute.xlu0 %1323 }
 0x1d2   :  { %v1346_v45 = vmax.f32 %v3058_v15, %v1324_v4  ;;  %v1361_v44 = vmul.f32 1.442695, %v1353_v23 }
 0x1d4   :  { %1387 = vrot.lane.b32.xlu1 %v1346_v45, %s1970_s19  ;;  %v1354_v21 = vsub.f32 %v3058_v15, %v1346_v45 }
 0x1d5   :  { %v1326_v11 = vpop.permute.xlu1 %1325 }
 0x1d6   :  { %v1347_v22 = vmax.f32 %v3070_v34, %v1326_v11  ;;  %v1363_v6 = vmul.f32 1.442695, %v1354_v21 }
 0x1d8   :  { %1389 = vrot.lane.b32.xlu0 %v1347_v22, %s1970_s19  ;;  %v1355_v54 = vsub.f32 %v3070_v34, %v1347_v22 }
 0x1d9   :  { %v1328_v60 = vpop.permute.xlu1 %1327 }
 0x1da   :  { %v1348_v61 = vmax.f32 %v3082_v27, %v1328_v60 }
 0x1dc   :  { %1391 = vrot.lane.b32.xlu1 %v1348_v61, %s1970_s19  ;;  %v1356_v47 = vsub.f32 %v3082_v27, %v1348_v61 }
 0x1dd   :  { %v1330_v43 = vpop.permute.xlu0 %1329 }
 0x1de   :  { %v1349_v35 = vmax.f32 %v3094_v53, %v1330_v43 }
 0x1e0   :  { %1393 = vrot.lane.b32.xlu0 %v1349_v35, %s1970_s19  ;;  %v1357_v25 = vsub.f32 %v3094_v53, %v1349_v35 }
 0x1e1   :  { %v1332_v40 = vpop.permute.xlu1 %1331 }
 0x1e2   :  { %v1350_v59 = vmax.f32 %v3104_v57, %v1332_v40  ;;  %v1369_v56 = vmul.f32 1.442695, %v1357_v25 }
 0x1e4   :  { %1395 = vrot.lane.b32.xlu1 %v1350_v59, %s1970_s19  ;;  %v1358_v26 = vsub.f32 %v3104_v57, %v1350_v59 }
 0x1e5   :  { %v1334_v8 = vpop.permute.xlu0 %1333 }
 0x1e6   :  { %v3123_v42 = vmax.f32 %v3108_v3, %v1334_v8  ;;  %v1371_v19 = vmul.f32 1.442695, %v1358_v26 }
 0x1e8   :  { %1397 = vrot.lane.b32.xlu0 %v3123_v42, %s1970_s19 }
 0x1e9   :  { %v1336_v51 = vpop.permute.xlu1 %1335 }
 0x1ea   :  { %v3127_v29 = vmax.f32 %v3112_v28, %v1336_v51 }
 0x1ec   :  { %1399 = vrot.lane.b32.xlu1 %v3127_v29, %s1970_s19  ;;  %1433 = vrot.lane.b32.xlu0 %v3047_v36, %s1971_s20 }
 0x1f0   :  { %1435 = vrot.lane.b32.xlu1 %v3058_v15, %s1971_s20  ;;  %1437 = vrot.lane.b32.xlu0 %v3070_v34, %s1971_s20 }
 0x1f4   :  { %1439 = vrot.lane.b32.xlu1 %v3082_v27, %s1971_s20  ;;  %1441 = vrot.lane.b32.xlu0 %v3094_v53, %s1971_s20 }
 0x1f8   :  { %1443 = vrot.lane.b32.xlu1 %v3104_v57, %s1971_s20  ;;  %1445 = vrot.lane.b32.xlu0 %v3108_v3, %s1971_s20 }
 0x1fc   :  { %1447 = vrot.lane.b32.xlu1 %v3112_v28, %s1971_s20 }
 0x242   :  { %v1386_v7 = vpop.permute.xlu0 %1385 }
 0x243   :  { %v1409_v16 = vsub.f32 %v3047_v36, %v1386_v7  ;;  %v1365_v36 = vmul.f32 1.442695, %v1355_v54 }
 0x245   :  { %v1417_v30 = vmul.f32 1.442695, %v1409_v16 }
 0x246   :  { %v1388_v52 = vpop.permute.xlu1 %1387 }
 0x247   :  { %1921 = vpow2.f32 %v1417_v30  ;;  %v1410_v17 = vsub.f32 %v3058_v15, %v1388_v52 }
 0x249   :  { %v1419_v37 = vmul.f32 1.442695, %v1410_v17 }
 0x24a   :  { %v1390_v58 = vpop.permute.xlu0 %1389 }
 0x24b   :  { %1923 = vpow2.f32 %v1419_v37  ;;  %v1411_v48 = vsub.f32 %v3070_v34, %v1390_v58  ;;  %v1367_v34 = vmul.f32 1.442695, %v1356_v47 }
 0x24d   :  { %v1421_v39 = vmul.f32 1.442695, %v1411_v48 }
 0x24e   :  { %v1392_v49 = vpop.permute.xlu1 %1391 }
 0x24f   :  { %1925 = vpow2.f32 %v1421_v39  ;;  %v1412_v24 = vsub.f32 %v3082_v27, %v1392_v49  ;;  %v1359_v39 = vsub.f32 %v3108_v3, %v3123_v42 }
 0x250   :  { %1927 = vpow2.f32 %v1361_v44 }
 0x251   :  { %v1423_v33 = vmul.f32 1.442695, %v1412_v24  ;;  %v1373_v49 = vmul.f32 1.442695, %v1359_v39  ;;  %v1360_v24 = vsub.f32 %v3112_v28, %v3127_v29 }
 0x252   :  { %v1394_v10 = vpop.permute.xlu0 %1393 }
 0x253   :  { %1929 = vpow2.f32 %v1423_v33  ;;  %v1413_v15 = vsub.f32 %v3094_v53, %v1394_v10  ;;  %v1375_v47 = vmul.f32 1.442695, %v1360_v24 }
 0x254   :  { %v1922_v31 = vpop.eup %1921  ;;  %1931 = vpow2.f32 %v1363_v6 }
 0x255   :  { %1933 = vpow2.f32 %v1365_v36  ;;  %v1425_v12 = vmul.f32 1.442695, %v1413_v15  ;;  %1473 = vrot.lane.b32.xlu0 %v1922_v31, %s1969_s0 }
 0x256   :  { %v1396_v27 = vpop.permute.xlu1 %1395 }
 0x257   :  { %1935 = vpow2.f32 %v1425_v12  ;;  %v1414_v41 = vsub.f32 %v3104_v57, %v1396_v27 }
 0x258   :  { %v1924_v50 = vpop.eup %1923  ;;  %1937 = vpow2.f32 %v1367_v34 }
 0x259   :  { %1939 = vpow2.f32 %v1369_v56  ;;  %v1427_v46 = vmul.f32 1.442695, %v1414_v41  ;;  %1475 = vrot.lane.b32.xlu1 %v1924_v50, %s1969_s0 }
 0x25a   :  { %v1398_v53 = vpop.permute.xlu0 %1397 }
 0x25b   :  { %1941 = vpow2.f32 %v1427_v46  ;;  %v1415_v13 = vsub.f32 %v3108_v3, %v1398_v53 }
 0x25c   :  { %v1926_v20 = vpop.eup %1925  ;;  %1943 = vpow2.f32 %v1371_v19 }
 0x25d   :  { %v1429_v32 = vmul.f32 1.442695, %v1415_v13  ;;  %1477 = vrot.lane.b32.xlu0 %v1926_v20, %s1969_s0  ;;  %v1928_v5 = vpop.eup %1927 }
 0x25e   :  { %v1400_v55 = vpop.permute.xlu1 %1399  ;;  %v1434_v38 = vpop.permute.xlu0 %1433 }
 0x25f   :  { %1945 = vpow2.f32 %v1429_v32  ;;  %v1416_v57 = vsub.f32 %v3112_v28, %v1400_v55  ;;  %v3155_v63 = vmul.f32 %v1928_v5, %v1434_v38  ;;  %v1505_v16 = vmul.f32 %v1922_v31, %v1434_v38 }
 0x260   :  { %v1930_v9 = vpop.eup %1929 }
 0x261   :  { %v1932_v0 = vpop.eup %1931  ;;  %v1431_v18 = vmul.f32 1.442695, %v1416_v57  ;;  %1479 = vrot.lane.b32.xlu1 %v1930_v9, %s1969_s0 }
 0x262   :  { %v1934_v2 = vpop.eup %1933  ;;  %v1436_v1 = vpop.permute.xlu1 %1435 }
 0x263   :  { %v1438_v62 = vpop.permute.xlu0 %1437  ;;  %1947 = vpow2.f32 %v1431_v18  ;;  %v3158_v14 = vmul.f32 %v1932_v0, %v1436_v1  ;;  %v1506_v52 = vmul.f32 %v1924_v50, %v1436_v1 }
 0x264   :  { %v3160_v4 = vmul.f32 %v1934_v2, %v1438_v62  ;;  %v1936_v45 = vpop.eup %1935  ;;  %v1507_v17 = vmul.f32 %v1926_v20, %v1438_v62  ;;  %1949 = vpow2.f32 %v1373_v49 }
 0x265   :  { %v1938_v11 = vpop.eup %1937  ;;  %1481 = vrot.lane.b32.xlu0 %v1936_v45, %s1969_s0  ;;  %1951 = vpow2.f32 %v1375_v47 }
 0x266   :  { %v1940_v22 = vpop.eup %1939  ;;  %v1440_v60 = vpop.permute.xlu1 %1439 }
 0x267   :  { %v1442_v61 = vpop.permute.xlu0 %1441  ;;  %v3163_v43 = vmul.f32 %v1938_v11, %v1440_v60  ;;  %v1508_v23 = vmul.f32 %v1930_v9, %v1440_v60 }
 0x268   :  { %v3165_v35 = vmul.f32 %v1940_v22, %v1442_v61  ;;  %v1942_v40 = vpop.eup %1941  ;;  %v1509_v37 = vmul.f32 %v1936_v45, %v1442_v61 }
 0x269   :  { %1483 = vrot.lane.b32.xlu1 %v1942_v40, %s1969_s0  ;;  %v1944_v59 = vpop.eup %1943 }
 0x26a   :  { %v1444_v8 = vpop.permute.xlu1 %1443 }
 0x26b   :  { %v3168_v51 = vmul.f32 %v1944_v59, %v1444_v8  ;;  %v3177_v58 = vpop.permute.xlu0 %1445  ;;  %v1510_v48 = vmul.f32 %v1942_v40, %v1444_v8 }
 0x26c   :  { %v1946_v7 = vpop.eup %1945 }
 0x26d   :  { %1485 = vrot.lane.b32.xlu0 %v1946_v7, %s1969_s0  ;;  %v1511_v21 = vmul.f32 %v1946_v7, %v3177_v58 }
 0x26e   :  { %v3182_v44 = vpop.permute.xlu1 %1447 }
 0x270   :  { %v1948_v30 = vpop.eup %1947 }
 0x271   :  { %1487 = vrot.lane.b32.xlu1 %v1948_v30, %s1969_s0  ;;  %1521 = vrot.lane.b32.xlu0 %v1505_v16, %s1969_s0  ;;  %v1512_v54 = vmul.f32 %v1948_v30, %v3182_v44  ;;  %v1950_v26 = vpop.eup %1949 }
 0x272   :  { %v1952_v27 = vpop.eup %1951 }
 0x275   :  { %1523 = vrot.lane.b32.xlu1 %v1506_v52, %s1969_s0  ;;  %1525 = vrot.lane.b32.xlu0 %v1507_v17, %s1969_s0 }
 0x279   :  { %1527 = vrot.lane.b32.xlu1 %v1508_v23, %s1969_s0  ;;  %1529 = vrot.lane.b32.xlu0 %v1509_v37, %s1969_s0 }
 0x27d   :  { %1531 = vrot.lane.b32.xlu1 %v1510_v48, %s1969_s0  ;;  %1533 = vrot.lane.b32.xlu0 %v1511_v21, %s1969_s0 }
 0x281   :  { %1535 = vrot.lane.b32.xlu1 %v1512_v54, %s1969_s0 }
 0x2c7   :  { %v1474_v6 = vpop.permute.xlu0 %1473 }
 0x2c8   :  { %v1497_v36 = vadd.f32 %v1928_v5, %v1474_v6 }
 0x2ca   :  { %1953 = vrcp.f32 %v1497_v36 }
 0x2cb   :  { %v1476_v25 = vpop.permute.xlu1 %1475 }
 0x2cc   :  { %v1498_v10 = vadd.f32 %v1932_v0, %v1476_v25 }
 0x2ce   :  { %1955 = vrcp.f32 %v1498_v10 }
 0x2cf   :  { %v1478_v33 = vpop.permute.xlu0 %1477 }
 0x2d0   :  { %v1499_v15 = vadd.f32 %v1934_v2, %v1478_v33 }
 0x2d2   :  { %1957 = vrcp.f32 %v1499_v15 }
 0x2d3   :  { %v1480_v31 = vpop.permute.xlu1 %1479 }
 0x2d4   :  { %v1500_v56 = vadd.f32 %v1938_v11, %v1480_v31 }
 0x2d6   :  { %1959 = vrcp.f32 %v1500_v56 }
 0x2d7   :  { %v1482_v34 = vpop.permute.xlu0 %1481  ;;  %v1954_v53 = vpop.eup %1953 }
 0x2d8   :  { %v1501_v3 = vadd.f32 %v1940_v22, %v1482_v34 }
 0x2da   :  { %1961 = vrcp.f32 %v1501_v3 }
 0x2db   :  { %v1484_v42 = vpop.permute.xlu1 %1483  ;;  %v1956_v5 = vpop.eup %1955 }
 0x2dc   :  { %v1502_v28 = vadd.f32 %v1944_v59, %v1484_v42  ;;  %v1464_v59 = vmul.f32 %v1952_v27, %v3182_v44 }
 0x2de   :  { %1963 = vrcp.f32 %v1502_v28 }
 0x2df   :  { %v1486_v29 = vpop.permute.xlu0 %1485  ;;  %v1958_v57 = vpop.eup %1957 }
 0x2e0   :  { %v1503_v12 = vadd.f32 %v1950_v26, %v1486_v29 }
 0x2e2   :  { %1965 = vrcp.f32 %v1503_v12 }
 0x2e3   :  { %v1488_v41 = vpop.permute.xlu1 %1487  ;;  %v1522_v50 = vpop.permute.xlu0 %1521 }
 0x2e4   :  { %v1504_v19 = vadd.f32 %v1952_v27, %v1488_v41  ;;  %v1545_v46 = vadd.f32 %v1522_v50, %v3155_v63  ;;  %v1960_v2 = vpop.eup %1959 }
 0x2e6   :  { %v1554_v13 = vmul.f32 %v1954_v53, %v1545_v46  ;;  %1967 = vrcp.f32 %v1504_v19 }
 0x2e7   :  { %v1524_v20 = vpop.permute.xlu1 %1523  ;;  %v1526_v32 = vpop.permute.xlu0 %1525 }
 0x2e8   :  { %1570 = vst.msk [vmem:[%s3232_s2] sm:$0xff] %vm1569_vm0, %v1554_v13  ;;  %v1546_v55 = vadd.f32 %v1524_v20, %v3158_v14  ;;  %v1547_v38 = vadd.f32 %v1526_v32, %v3160_v4  ;;  %v1962_v14 = vpop.eup %1961  ;;  %v1463_v4 = vmul.f32 %v1950_v26, %v3177_v58 }
 0x2ea   :  { %v1556_v9 = vmul.f32 %v1956_v5, %v1546_v55  ;;  %v1558_v0 = vmul.f32 %v1958_v57, %v1547_v38 }
 0x2eb   :  { %v1528_v63 = vpop.permute.xlu1 %1527  ;;  %v1530_v18 = vpop.permute.xlu0 %1529 }
 0x2ec   :  { %1571 = vst.msk [vmem:[%s3232_s2 + $0x8] sm:$0xff] %vm1569_vm0, %v1556_v9  ;;  %1572 = vst.msk [vmem:[%s3232_s2 + $0x10] sm:$0xff] %vm1569_vm0, %v1558_v0  ;;  %v1548_v1 = vadd.f32 %v1528_v63, %v3163_v43  ;;  %v1549_v62 = vadd.f32 %v1530_v18, %v3165_v35  ;;  %v1964_v61 = vpop.eup %1963 }
 0x2ee   :  { %v1560_v45 = vmul.f32 %v1960_v2, %v1548_v1  ;;  %v1562_v11 = vmul.f32 %v1962_v14, %v1549_v62 }
 0x2ef   :  { %v1532_v22 = vpop.permute.xlu1 %1531  ;;  %v1534_v60 = vpop.permute.xlu0 %1533 }
 0x2f0   :  { %1573 = vst.msk [vmem:[%s3232_s2 + $0x18] sm:$0xff] %vm1569_vm0, %v1560_v45  ;;  %1574 = vst.msk [vmem:[%s3232_s2 + $0x20] sm:$0xff] %vm1569_vm0, %v1562_v11  ;;  %v1550_v43 = vadd.f32 %v1532_v22, %v3168_v51  ;;  %v1551_v35 = vadd.f32 %v1534_v60, %v1463_v4  ;;  %v1966_v40 = vpop.eup %1965 }
 0x2f2   :  { %v1564_v8 = vmul.f32 %v1964_v61, %v1550_v43  ;;  %v1566_v7 = vmul.f32 %v1966_v40, %v1551_v35 }
 0x2f3   :  { %v1536_v16 = vpop.permute.xlu1 %1535  ;;  %v1968_v52 = vpop.eup %1967 }
 0x2f4   :  { %1575 = vst.msk [vmem:[%s3232_s2 + $0x28] sm:$0xff] %vm1569_vm0, %v1564_v8  ;;  %1576 = vst.msk [vmem:[%s3232_s2 + $0x30] sm:$0xff] %vm1569_vm0, %v1566_v7  ;;  %v1552_v30 = vadd.f32 %v1536_v16, %v1464_v59 }
 0x2f6   :  { %v1568_v51 = vmul.f32 %v1968_v52, %v1552_v30 }
 0x2f8   :  { %1577 = vst.msk [vmem:[%s3232_s2 + $0x38] sm:$0xff] %vm1569_vm0, %v1568_v51 }

</bundles_post_ra>
